<compile_context>
chip_gen: v7x
topology: tpu7x:2x2x1
jax: 0.10.0
libtpu: 0.0.40
codegen_flags: <defaults>
</compile_context>

<pallas_src>
import math
import functools

import jax
import jax.numpy as jnp
from jax import lax
from jax.experimental import pallas as pl
from jax.experimental.pallas import tpu as pltpu


# ----------------------------------------------------------------------------
# Kernel bodies
# ----------------------------------------------------------------------------

def _attention_core(qp, kp, vp, wo, o_ref, cat_ref, *, num_heads, d_k, cdt,
                    exp_dtype, exact_softmax):
    """Scaled-dot-product attention + output projection.

    qp: (TB*Sq, E) f32, kp/vp: (TB*Skv, E) f32, wo: (E, E) compute dtype.
    cat_ref: (TB, Sq, E) compute-dtype VMEM scratch used to assemble per-head
    outputs at static lane offsets (replaces the previous jnp.concatenate).
    """
    TB, Sq, E = o_ref.shape
    Skv = kp.shape[0] // TB
    scale = 1.0 / math.sqrt(d_k)

    # Scale the (small) projected Q before QK^T; cast back for the MXU.
    qp = (qp * scale).astype(cdt).reshape(TB, Sq, E)
    kp = kp.astype(cdt).reshape(TB, Skv, E)
    vp = vp.astype(cdt).reshape(TB, Skv, E)

    for h in range(num_heads):             # static, small H
        lo = h * d_k
        qh = qp[:, :, lo:lo + d_k]         # (TB, Sq, d_k)
        kh = kp[:, :, lo:lo + d_k]         # (TB, Skv, d_k)
        vh = vp[:, :, lo:lo + d_k]

        # scores = qh @ kh^T, batched over TB; contraction on the last dims so
        # no explicit transpose is materialized.
        s = lax.dot_general(
            qh, kh,
            dimension_numbers=(((2,), (2,)), ((0,), (0,))),
            preferred_element_type=jnp.float32)            # (TB, Sq, Skv) f32

        m = jnp.max(s, axis=-1, keepdims=True)
        # bf16 exp on v6e/v7x (free-ish EUP width), f32 exp on v5e/older.
        p = jnp.exp((s - m).astype(exp_dtype))             # unnormalized probs
        l = jnp.sum(p.astype(jnp.float32), axis=-1, keepdims=True)   # (TB,Sq,1)

        # (P @ V) first, then normalize the smaller (TB, Sq, d_k) result.
        ho = lax.dot_general(
            p.astype(cdt), vh,
            dimension_numbers=(((2,), (1,)), ((0,), (0,))),
            preferred_element_type=jnp.float32)            # (TB, Sq, d_k) f32
        if exact_softmax:
            ho = ho / l
        else:
            ho = ho * pl.reciprocal(l, approx=True)        # EUP slot

        # Assemble heads at static offsets (no lane-axis concatenate).
        cat_ref[:, :, lo:lo + d_k] = ho.astype(cdt)

    out = jnp.dot(cat_ref[...].reshape(TB * Sq, E), wo,
                  preferred_element_type=jnp.float32)      # (TB*Sq, E)
    o_ref[...] = out.reshape(TB, Sq, E).astype(o_ref.dtype)


def _mha_self_kernel(x_ref, wqkv_ref, wo_ref, o_ref, cat_ref, *,
                     num_heads, d_k, exp_dtype, exact_softmax):
    """Self-attention fast path: one input stream, fused (E, 3E) QKV weight."""
    TB, S, E = x_ref.shape
    cdt = wqkv_ref.dtype
    x = x_ref[...].astype(cdt).reshape(TB * S, E)          # cast after load

    qkv = jnp.dot(x, wqkv_ref[...],
                  preferred_element_type=jnp.float32)      # (TB*S, 3E) f32
    qp = qkv[:, 0 * E:1 * E]
    kp = qkv[:, 1 * E:2 * E]
    vp = qkv[:, 2 * E:3 * E]

    _attention_core(qp, kp, vp, wo_ref[...], o_ref, cat_ref,
                    num_heads=num_heads, d_k=d_k, cdt=cdt,
                    exp_dtype=exp_dtype, exact_softmax=exact_softmax)


def _mha_cross_kernel(q_ref, k_ref, v_ref, wqkv_ref, wo_ref, o_ref, cat_ref, *,
                      num_heads, d_k, exp_dtype, exact_softmax):
    """General (cross-attention capable) path: three input streams."""
    TB, Sq, E = q_ref.shape
    _, Skv, _ = k_ref.shape
    cdt = wqkv_ref.dtype

    q = q_ref[...].astype(cdt).reshape(TB * Sq, E)         # cast after load
    k = k_ref[...].astype(cdt).reshape(TB * Skv, E)
    v = v_ref[...].astype(cdt).reshape(TB * Skv, E)

    qp = jnp.dot(q, wqkv_ref[0], preferred_element_type=jnp.float32)
    kp = jnp.dot(k, wqkv_ref[1], preferred_element_type=jnp.float32)
    vp = jnp.dot(v, wqkv_ref[2], preferred_element_type=jnp.float32)

    _attention_core(qp, kp, vp, wo_ref[...], o_ref, cat_ref,
                    num_heads=num_heads, d_k=d_k, cdt=cdt,
                    exp_dtype=exp_dtype, exact_softmax=exact_softmax)


# ----------------------------------------------------------------------------
# Chip-aware sizing helpers
# ----------------------------------------------------------------------------

def _device_kind():
    try:
        return jax.devices()[0].device_kind.lower()
    except Exception:
        return ""


def _default_exp_dtype(cdt):
    """bf16 exp only on v6e/v7x (bf16 EUP/VPU); f32 everywhere else."""
    kind = _device_kind()
    if (("v6" in kind) or ("v7" in kind) or ("7x" in kind)) and \
            jnp.dtype(cdt) == jnp.dtype(jnp.bfloat16):
        return jnp.dtype(jnp.bfloat16)
    return jnp.dtype(jnp.float32)


def _chip_vmem_config():
    """Returns (block_budget_bytes, vmem_limit_bytes, prefer_even_steps)."""
    kind = _device_kind()
    big_vmem = any(t in kind for t in ("v2", "v3", "v4", "v5", "v6"))
    small = ("v7" in kind) or ("7x" in kind) or not big_vmem
    if small:
        # v7x: 64 MiB physical VMEM/TC and 2 TensorCores -> conservative budget,
        # keep the grid-step count a multiple of 2 for megacore sharding.
        return 24 * 1024 * 1024, 40 * 1024 * 1024, True
    # v5e/v6e (and v2-v4): 128 MiB physical -> bigger blocks, raised scoped limit.
    return 48 * 1024 * 1024, 64 * 1024 * 1024, False


def _choose_tb(bn, bytes_for_tb, budget, prefer_even_steps):
    """Largest TB dividing BN whose estimated per-step VMEM footprint fits the
    budget; prefers >= 2 grid steps (pipelining / megacore) and, on v7x-class
    chips, an even step count."""
    best, best_key = 1, None
    for tb in range(1, bn + 1):
        if bn % tb:
            continue
        if tb > 1 and bytes_for_tb(tb) > budget:
            continue
        steps = bn // tb
        multi_ok = (steps >= 2) or (bn < 2)
        even_ok = (not prefer_even_steps) or (steps % 2 == 0) or (bn < 2)
        key = (multi_ok, even_ok, tb)
        if best_key is None or key > best_key:
            best, best_key = tb, key
    return best


# ----------------------------------------------------------------------------
# Wrapper
# ----------------------------------------------------------------------------

def multi_head_attention_block(q, k, v, wq_t, wk_t, wv_t, wo_t, num_heads, *,
                               compute_dtype=jnp.bfloat16, block_batch=None,
                               exp_dtype=None, exact_softmax=False):
    """q: (B, N, Sq, E); k, v: (B, N, Skv, E).  wX_t: (E, E) transposed Linear
    weights (bias=False), i.e. y = x @ wX_t.  Eval-mode forward, mask=None."""
    B, N, Sq, E = q.shape
    Bk, Nk, Skv, Ek = k.shape
    assert k.shape == v.shape
    assert (Bk, Nk, Ek) == (B, N, E)
    assert E % num_heads == 0
    d_k = E // num_heads
    BN = B * N
    out_dtype = q.dtype
    cdt = jnp.dtype(compute_dtype)
    in_it = jnp.dtype(q.dtype).itemsize
    out_it = jnp.dtype(out_dtype).itemsize
    cit = cdt.itemsize

    self_attn = (q is k) and (q is v)

    if exp_dtype is None:
        exp_dtype = _default_exp_dtype(cdt)
    exp_dtype = jnp.dtype(exp_dtype)

    budget, vmem_limit, prefer_even = _chip_vmem_config()

    # Per-step VMEM footprint estimate: double-buffered I/O streams, weights,
    # f32 projections + compute-dtype copies, live (TB,Sq,Skv) scores + probs,
    # concat scratch and the f32 output of the Wo matmul.
    def bytes_for_tb(tb):
        blk_q = tb * Sq * E
        blk_kv = tb * Skv * E
        act_rows = blk_q + (0 if self_attn else 2 * blk_kv)
        io = 2 * (blk_q if self_attn else blk_q + 2 * blk_kv) * in_it \
            + 2 * blk_q * out_it
        w = 2 * (3 * E * E + E * E) * cit
        proj = act_rows * cit + 3 * max(blk_q, blk_kv) * 4 \
            + (blk_q + 2 * blk_kv) * cit
        scores = 2 * tb * Sq * Skv * 4
        tail = blk_q * cit + blk_q * 4
        return io + w + proj + scores + tail

    if block_batch is None:
        block_batch = _choose_tb(BN, bytes_for_tb, budget, prefer_even)
    TB = block_batch
    assert BN % TB == 0
    grid = (BN // TB,)

    q2 = q.reshape(BN, Sq, E)                       # NOTE: no dtype cast here —
    wo2 = wo_t.astype(cdt)                          # the kernel casts after load.

    q_spec = pl.BlockSpec((TB, Sq, E), lambda i: (i, 0, 0))
    kv_spec = pl.BlockSpec((TB, Skv, E), lambda i: (i, 0, 0))
    wo_spec = pl.BlockSpec((E, E), lambda i: (0, 0))
    out_spec = pl.BlockSpec((TB, Sq, E), lambda i: (i, 0, 0))

    flops = int(2 * BN * E * (2 * Sq * E + 2 * Skv * E + 2 * Sq * Skv))
    transcendentals = int(BN * num_heads * Sq * Skv)
    act_bytes = (BN * Sq * E if self_attn else BN * (Sq + 2 * Skv) * E) * in_it
    bytes_accessed = int(act_bytes + 4 * E * E * cit + BN * Sq * E * out_it)
    cost = pl.CostEstimate(flops=flops, transcendentals=transcendentals,
                           bytes_accessed=bytes_accessed)

    common_kwargs = dict(num_heads=num_heads, d_k=d_k,
                         exp_dtype=exp_dtype, exact_softmax=exact_softmax)

    if self_attn:
        wqkv = jnp.concatenate([wq_t, wk_t, wv_t], axis=1).astype(cdt)  # (E, 3E)
        kernel = functools.partial(_mha_self_kernel, **common_kwargs)
        in_specs = [q_spec, pl.BlockSpec((E, 3 * E), lambda i: (0, 0)), wo_spec]
        operands = (q2, wqkv, wo2)
    else:
        wqkv = jnp.stack([wq_t, wk_t, wv_t]).astype(cdt)                # (3, E, E)
        k2 = k.reshape(BN, Skv, E)
        v2 = v.reshape(BN, Skv, E)
        kernel = functools.partial(_mha_cross_kernel, **common_kwargs)
        in_specs = [q_spec, kv_spec, kv_spec,
                    pl.BlockSpec((3, E, E), lambda i: (0, 0, 0)), wo_spec]
        operands = (q2, k2, v2, wqkv, wo2)

    out = pl.pallas_call(
        kernel,
        out_shape=jax.ShapeDtypeStruct((BN, Sq, E), out_dtype),
        grid_spec=pltpu.PrefetchScalarGridSpec(
            num_scalar_prefetch=0,
            grid=grid,
            in_specs=in_specs,
            out_specs=out_spec,
            scratch_shapes=[pltpu.VMEM((TB, Sq, E), cdt)],
        ),
        compiler_params=pltpu.CompilerParams(
            dimension_semantics=("parallel",),
            vmem_limit_bytes=vmem_limit),
        cost_estimate=cost,
    )(*operands)

    return out.reshape(B, N, Sq, E)


# ----------------------------------------------------------------------------
# Pure-JAX reference (mirrors the PyTorch forward; mask=None, eval mode)
# ----------------------------------------------------------------------------

def _reference(q, k, v, wq_t, wk_t, wv_t, wo_t, num_heads):
    B, N, Sq, E = q.shape
    d_k = E // num_heads
    qp = q @ wq_t
    kp = k @ wk_t
    vp = v @ wv_t

    def split(x):  # (B, N, S, E) -> (B, N, h, S, d_k)
        b, n, s, e = x.shape
        return x.reshape(b, n, s, num_heads, d_k).transpose(0, 1, 3, 2, 4)

    qh, kh, vh = split(qp), split(kp), split(vp)
    scores = jnp.einsum("bnhsd,bnhtd->bnhst", qh, kh) / math.sqrt(d_k)
    p = jax.nn.softmax(scores, axis=-1)
    x = jnp.einsum("bnhst,bnhtd->bnhsd", p, vh)
    x = x.transpose(0, 1, 3, 2, 4).reshape(B, N, Sq, E)
    return x @ wo_t


if __name__ == "__main__":
    # Small shapes consistent with the module's 4-D forward: (B, N, S, E).
    B, N, S, E, H = 2, 2, 8, 32, 4

    key = jax.random.PRNGKey(0)
    kq, kk, kv, k1, k2, k3, k4 = jax.random.split(key, 7)

    q = jax.random.normal(kq, (B, N, S, E), dtype=jnp.float32)
    k = jax.random.normal(kk, (B, N, S, E), dtype=jnp.float32)
    v = jax.random.normal(kv, (B, N, S, E), dtype=jnp.float32)

    # Deterministic Linear weights (bias=False), stored pre-transposed: y = x @ W^T.
    bound = 1.0 / math.sqrt(E)
    wq_t = jax.random.uniform(k1, (E, E), jnp.float32, -bound, bound)
    wk_t = jax.random.uniform(k2, (E, E), jnp.float32, -bound, bound)
    wv_t = jax.random.uniform(k3, (E, E), jnp.float32, -bound, bound)
    wo_t = jax.random.uniform(k4, (E, E), jnp.float32, -bound, bound)

    # The kernel feeds the MXU in bf16 (f32 accumulation); compare against an
    # f32 reference run on the same bf16-rounded operands.
    def r(x):
        return x.astype(jnp.bfloat16).astype(jnp.float32)

    # --- cross-attention path (q, k, v distinct) ------------------------------
    out_x = multi_head_attention_block(q, k, v, wq_t, wk_t, wv_t, wo_t, H)
    out_x = jax.block_until_ready(out_x)
    ref_x = _reference(r(q), r(k), r(v), r(wq_t), r(wk_t), r(wv_t), r(wo_t), H)
    assert out_x.shape == (B, N, S, E)
    assert jnp.allclose(out_x, ref_x, atol=3e-2, rtol=3e-2), (
        "cross-attention mismatch vs reference: max abs err "
        f"{float(jnp.max(jnp.abs(out_x - ref_x)))}")

    # --- self-attention fast path (q is k is v) -------------------------------
    out_s = multi_head_attention_block(q, q, q, wq_t, wk_t, wv_t, wo_t, H)
    out_s = jax.block_until_ready(out_s)
    ref_s = _reference(r(q), r(q), r(q), r(wq_t), r(wk_t), r(wv_t), r(wo_t), H)
    assert out_s.shape == (B, N, S, E)
    assert jnp.allclose(out_s, ref_s, atol=3e-2, rtol=3e-2), (
        "self-attention mismatch vs reference: max abs err "
        f"{float(jnp.max(jnp.abs(out_s - ref_s)))}")

    print("KERNEL_OK")
</pallas_src>

<mosaic_0001>
module attributes {stable_mosaic.version = 11 : i64} {
  func.func @_mha_cross_kernel(%arg0: i32, %arg1: memref<2x8x32xf32, #tpu.memory_space<vmem>>, %arg2: memref<2x8x32xf32, #tpu.memory_space<vmem>>, %arg3: memref<2x8x32xf32, #tpu.memory_space<vmem>>, %arg4: memref<3x32x32xbf16, #tpu.memory_space<vmem>>, %arg5: memref<32x32xbf16, #tpu.memory_space<vmem>>, %arg6: memref<2x8x32xf32, #tpu.memory_space<vmem>>, %arg7: memref<2x8x32xbf16, #tpu.memory_space<vmem>>) attributes {dimension_semantics = [#tpu.dimension_semantics<parallel>], iteration_bounds = array<i64: 2>, scalar_prefetch = 0 : i64, scratch_operands = 1 : i64, tpu.core_type = #tpu.core_type<tc>, window_params = [{transform_indices = @transform_0, window_bounds = array<i64: 2, 8, 32>}, {transform_indices = @transform_1, window_bounds = array<i64: 2, 8, 32>}, {transform_indices = @transform_2, window_bounds = array<i64: 2, 8, 32>}, {pipeline_mode = #tpu.pipeline_mode<synchronous>, transform_indices = @transform_3, window_bounds = array<i64: 3, 32, 32>}, {pipeline_mode = #tpu.pipeline_mode<synchronous>, transform_indices = @transform_4, window_bounds = array<i64: 32, 32>}, {transform_indices = @transform_5, window_bounds = array<i64: 2, 8, 32>}]} {
    %c0 = arith.constant 0 : index
    %c0_0 = arith.constant 0 : index
    %c0_1 = arith.constant 0 : index
    %0 = vector.load %arg1[%c0, %c0_0, %c0_1] : memref<2x8x32xf32, #tpu.memory_space<vmem>>, vector<2x8x32xf32>
    %1 = arith.truncf %0 : vector<2x8x32xf32> to vector<2x8x32xbf16>
    %2 = vector.shape_cast %1 : vector<2x8x32xbf16> to vector<16x32xbf16>
    %c0_2 = arith.constant 0 : index
    %c0_3 = arith.constant 0 : index
    %c0_4 = arith.constant 0 : index
    %3 = vector.load %arg2[%c0_2, %c0_3, %c0_4] : memref<2x8x32xf32, #tpu.memory_space<vmem>>, vector<2x8x32xf32>
    %4 = arith.truncf %3 : vector<2x8x32xf32> to vector<2x8x32xbf16>
    %5 = vector.shape_cast %4 : vector<2x8x32xbf16> to vector<16x32xbf16>
    %c0_5 = arith.constant 0 : index
    %c0_6 = arith.constant 0 : index
    %c0_7 = arith.constant 0 : index
    %6 = vector.load %arg3[%c0_5, %c0_6, %c0_7] : memref<2x8x32xf32, #tpu.memory_space<vmem>>, vector<2x8x32xf32>
    %7 = arith.truncf %6 : vector<2x8x32xf32> to vector<2x8x32xbf16>
    %8 = vector.shape_cast %7 : vector<2x8x32xbf16> to vector<16x32xbf16>
    %c0_8 = arith.constant 0 : index
    %c0_9 = arith.constant 0 : index
    %c0_10 = arith.constant 0 : index
    %9 = vector.load %arg4[%c0_8, %c0_9, %c0_10] : memref<3x32x32xbf16, #tpu.memory_space<vmem>>, vector<1x32x32xbf16>
    %10 = vector.shape_cast %9 : vector<1x32x32xbf16> to vector<32x32xbf16>
    %cst = arith.constant dense<0.000000e+00> : vector<16x32xf32>
    %11 = tpu.matmul %2, %10, %cst {dimension_numbers = #tpu.dot_dimension_numbers<[1], [0], [0], [1], [0, 0, 1, 1], [], []>} : vector<16x32xbf16>, vector<32x32xbf16>, vector<16x32xf32> -> vector<16x32xf32>
    %c1 = arith.constant 1 : index
    %c0_11 = arith.constant 0 : index
    %c0_12 = arith.constant 0 : index
    %12 = vector.load %arg4[%c1, %c0_11, %c0_12] : memref<3x32x32xbf16, #tpu.memory_space<vmem>>, vector<1x32x32xbf16>
    %13 = vector.shape_cast %12 : vector<1x32x32xbf16> to vector<32x32xbf16>
    %cst_13 = arith.constant dense<0.000000e+00> : vector<16x32xf32>
    %14 = tpu.matmul %5, %13, %cst_13 {dimension_numbers = #tpu.dot_dimension_numbers<[1], [0], [0], [1], [0, 0, 1, 1], [], []>} : vector<16x32xbf16>, vector<32x32xbf16>, vector<16x32xf32> -> vector<16x32xf32>
    %c2 = arith.constant 2 : index
    %c0_14 = arith.constant 0 : index
    %c0_15 = arith.constant 0 : index
    %15 = vector.load %arg4[%c2, %c0_14, %c0_15] : memref<3x32x32xbf16, #tpu.memory_space<vmem>>, vector<1x32x32xbf16>
    %16 = vector.shape_cast %15 : vector<1x32x32xbf16> to vector<32x32xbf16>
    %cst_16 = arith.constant dense<0.000000e+00> : vector<16x32xf32>
    %17 = tpu.matmul %8, %16, %cst_16 {dimension_numbers = #tpu.dot_dimension_numbers<[1], [0], [0], [1], [0, 0, 1, 1], [], []>} : vector<16x32xbf16>, vector<32x32xbf16>, vector<16x32xf32> -> vector<16x32xf32>
    %c0_17 = arith.constant 0 : index
    %c0_18 = arith.constant 0 : index
    %18 = vector.load %arg5[%c0_17, %c0_18] : memref<32x32xbf16, #tpu.memory_space<vmem>>, vector<32x32xbf16>
    %cst_19 = arith.constant 0.353553385 : f32
    %19 = vector.broadcast %cst_19 : f32 to vector<16x32xf32>
    %20 = arith.mulf %11, %19 : vector<16x32xf32>
    %21 = arith.truncf %20 : vector<16x32xf32> to vector<16x32xbf16>
    %22 = vector.shape_cast %21 : vector<16x32xbf16> to vector<2x8x32xbf16>
    %23 = arith.truncf %14 : vector<16x32xf32> to vector<16x32xbf16>
    %24 = vector.shape_cast %23 : vector<16x32xbf16> to vector<2x8x32xbf16>
    %25 = arith.truncf %17 : vector<16x32xf32> to vector<16x32xbf16>
    %26 = vector.shape_cast %25 : vector<16x32xbf16> to vector<2x8x32xbf16>
    %27 = vector.extract_strided_slice %22 {offsets = [0, 0, 0], sizes = [2, 8, 8], strides = [1, 1, 1]} : vector<2x8x32xbf16> to vector<2x8x8xbf16>
    %28 = vector.extract_strided_slice %24 {offsets = [0, 0, 0], sizes = [2, 8, 8], strides = [1, 1, 1]} : vector<2x8x32xbf16> to vector<2x8x8xbf16>
    %29 = vector.extract_strided_slice %26 {offsets = [0, 0, 0], sizes = [2, 8, 8], strides = [1, 1, 1]} : vector<2x8x32xbf16> to vector<2x8x8xbf16>
    %cst_20 = arith.constant dense<0.000000e+00> : vector<2x8x8xf32>
    %30 = tpu.matmul %27, %28, %cst_20 {dimension_numbers = #tpu.dot_dimension_numbers<[2], [2], [1], [1], [0, 0, 0, 1, 1, 1], [0], [0]>} : vector<2x8x8xbf16>, vector<2x8x8xbf16>, vector<2x8x8xf32> -> vector<2x8x8xf32>
    %cst_21 = arith.constant dense<0xFF800000> : vector<2x8xf32>
    %31 = vector.multi_reduction <maximumf>, %30, %cst_21 [2] : vector<2x8x8xf32> to vector<2x8xf32>
    %32 = vector.shape_cast %31 : vector<2x8xf32> to vector<2x8x1xf32>
    %33 = vector.broadcast %32 : vector<2x8x1xf32> to vector<2x8x8xf32>
    %34 = arith.subf %30, %33 : vector<2x8x8xf32>
    %35 = math.exp %34 : vector<2x8x8xf32>
    %cst_22 = arith.constant dense<0.000000e+00> : vector<2x8xf32>
    %36 = vector.multi_reduction <add>, %35, %cst_22 [2] : vector<2x8x8xf32> to vector<2x8xf32>
    %37 = vector.shape_cast %36 : vector<2x8xf32> to vector<2x8x1xf32>
    %38 = arith.truncf %35 : vector<2x8x8xf32> to vector<2x8x8xbf16>
    %cst_23 = arith.constant dense<0.000000e+00> : vector<2x8x8xf32>
    %39 = tpu.matmul %38, %29, %cst_23 {dimension_numbers = #tpu.dot_dimension_numbers<[2], [1], [1], [2], [0, 0, 0, 1, 1, 2], [0], [0]>} : vector<2x8x8xbf16>, vector<2x8x8xbf16>, vector<2x8x8xf32> -> vector<2x8x8xf32>
    %40 = tpu.reciprocal %37 {approx = true} : vector<2x8x1xf32> -> vector<2x8x1xf32>
    %41 = vector.broadcast %40 : vector<2x8x1xf32> to vector<2x8x8xf32>
    %42 = arith.mulf %39, %41 : vector<2x8x8xf32>
    %43 = arith.truncf %42 : vector<2x8x8xf32> to vector<2x8x8xbf16>
    %c0_24 = arith.constant 0 : index
    %c0_25 = arith.constant 0 : index
    %c0_26 = arith.constant 0 : index
    %44 = vector.load %arg7[%c0_24, %c0_25, %c0_26] : memref<2x8x32xbf16, #tpu.memory_space<vmem>>, vector<2x8x8xbf16>
    tpu.vector_store %arg7[%c0_24, %c0_25, %c0_26], %43 {strides = array<i32>} : memref<2x8x32xbf16, #tpu.memory_space<vmem>>, vector<2x8x8xbf16>,
    %45 = vector.extract_strided_slice %22 {offsets = [0, 0, 8], sizes = [2, 8, 8], strides = [1, 1, 1]} : vector<2x8x32xbf16> to vector<2x8x8xbf16>
    %46 = vector.extract_strided_slice %24 {offsets = [0, 0, 8], sizes = [2, 8, 8], strides = [1, 1, 1]} : vector<2x8x32xbf16> to vector<2x8x8xbf16>
    %47 = vector.extract_strided_slice %26 {offsets = [0, 0, 8], sizes = [2, 8, 8], strides = [1, 1, 1]} : vector<2x8x32xbf16> to vector<2x8x8xbf16>
    %cst_27 = arith.constant dense<0.000000e+00> : vector<2x8x8xf32>
    %48 = tpu.matmul %45, %46, %cst_27 {dimension_numbers = #tpu.dot_dimension_numbers<[2], [2], [1], [1], [0, 0, 0, 1, 1, 1], [0], [0]>} : vector<2x8x8xbf16>, vector<2x8x8xbf16>, vector<2x8x8xf32> -> vector<2x8x8xf32>
    %cst_28 = arith.constant dense<0xFF800000> : vector<2x8xf32>
    %49 = vector.multi_reduction <maximumf>, %48, %cst_28 [2] : vector<2x8x8xf32> to vector<2x8xf32>
    %50 = vector.shape_cast %49 : vector<2x8xf32> to vector<2x8x1xf32>
    %51 = vector.broadcast %50 : vector<2x8x1xf32> to vector<2x8x8xf32>
    %52 = arith.subf %48, %51 : vector<2x8x8xf32>
    %53 = math.exp %52 : vector<2x8x8xf32>
    %cst_29 = arith.constant dense<0.000000e+00> : vector<2x8xf32>
    %54 = vector.multi_reduction <add>, %53, %cst_29 [2] : vector<2x8x8xf32> to vector<2x8xf32>
    %55 = vector.shape_cast %54 : vector<2x8xf32> to vector<2x8x1xf32>
    %56 = arith.truncf %53 : vector<2x8x8xf32> to vector<2x8x8xbf16>
    %cst_30 = arith.constant dense<0.000000e+00> : vector<2x8x8xf32>
    %57 = tpu.matmul %56, %47, %cst_30 {dimension_numbers = #tpu.dot_dimension_numbers<[2], [1], [1], [2], [0, 0, 0, 1, 1, 2], [0], [0]>} : vector<2x8x8xbf16>, vector<2x8x8xbf16>, vector<2x8x8xf32> -> vector<2x8x8xf32>
    %58 = tpu.reciprocal %55 {approx = true} : vector<2x8x1xf32> -> vector<2x8x1xf32>
    %59 = vector.broadcast %58 : vector<2x8x1xf32> to vector<2x8x8xf32>
    %60 = arith.mulf %57, %59 : vector<2x8x8xf32>
    %61 = arith.truncf %60 : vector<2x8x8xf32> to vector<2x8x8xbf16>
    %c0_31 = arith.constant 0 : index
    %c0_32 = arith.constant 0 : index
    %c8 = arith.constant 8 : index
    %62 = vector.load %arg7[%c0_31, %c0_32, %c8] : memref<2x8x32xbf16, #tpu.memory_space<vmem>>, vector<2x8x8xbf16>
    tpu.vector_store %arg7[%c0_31, %c0_32, %c8], %61 {strides = array<i32>} : memref<2x8x32xbf16, #tpu.memory_space<vmem>>, vector<2x8x8xbf16>,
    %63 = vector.extract_strided_slice %22 {offsets = [0, 0, 16], sizes = [2, 8, 8], strides = [1, 1, 1]} : vector<2x8x32xbf16> to vector<2x8x8xbf16>
    %64 = vector.extract_strided_slice %24 {offsets = [0, 0, 16], sizes = [2, 8, 8], strides = [1, 1, 1]} : vector<2x8x32xbf16> to vector<2x8x8xbf16>
    %65 = vector.extract_strided_slice %26 {offsets = [0, 0, 16], sizes = [2, 8, 8], strides = [1, 1, 1]} : vector<2x8x32xbf16> to vector<2x8x8xbf16>
    %cst_33 = arith.constant dense<0.000000e+00> : vector<2x8x8xf32>
    %66 = tpu.matmul %63, %64, %cst_33 {dimension_numbers = #tpu.dot_dimension_numbers<[2], [2], [1], [1], [0, 0, 0, 1, 1, 1], [0], [0]>} : vector<2x8x8xbf16>, vector<2x8x8xbf16>, vector<2x8x8xf32> -> vector<2x8x8xf32>
    %cst_34 = arith.constant dense<0xFF800000> : vector<2x8xf32>
    %67 = vector.multi_reduction <maximumf>, %66, %cst_34 [2] : vector<2x8x8xf32> to vector<2x8xf32>
    %68 = vector.shape_cast %67 : vector<2x8xf32> to vector<2x8x1xf32>
    %69 = vector.broadcast %68 : vector<2x8x1xf32> to vector<2x8x8xf32>
    %70 = arith.subf %66, %69 : vector<2x8x8xf32>
    %71 = math.exp %70 : vector<2x8x8xf32>
    %cst_35 = arith.constant dense<0.000000e+00> : vector<2x8xf32>
    %72 = vector.multi_reduction <add>, %71, %cst_35 [2] : vector<2x8x8xf32> to vector<2x8xf32>
    %73 = vector.shape_cast %72 : vector<2x8xf32> to vector<2x8x1xf32>
    %74 = arith.truncf %71 : vector<2x8x8xf32> to vector<2x8x8xbf16>
    %cst_36 = arith.constant dense<0.000000e+00> : vector<2x8x8xf32>
    %75 = tpu.matmul %74, %65, %cst_36 {dimension_numbers = #tpu.dot_dimension_numbers<[2], [1], [1], [2], [0, 0, 0, 1, 1, 2], [0], [0]>} : vector<2x8x8xbf16>, vector<2x8x8xbf16>, vector<2x8x8xf32> -> vector<2x8x8xf32>
    %76 = tpu.reciprocal %73 {approx = true} : vector<2x8x1xf32> -> vector<2x8x1xf32>
    %77 = vector.broadcast %76 : vector<2x8x1xf32> to vector<2x8x8xf32>
    %78 = arith.mulf %75, %77 : vector<2x8x8xf32>
    %79 = arith.truncf %78 : vector<2x8x8xf32> to vector<2x8x8xbf16>
    %c0_37 = arith.constant 0 : index
    %c0_38 = arith.constant 0 : index
    %c16 = arith.constant 16 : index
    %80 = vector.load %arg7[%c0_37, %c0_38, %c16] : memref<2x8x32xbf16, #tpu.memory_space<vmem>>, vector<2x8x8xbf16>
    tpu.vector_store %arg7[%c0_37, %c0_38, %c16], %79 {strides = array<i32>} : memref<2x8x32xbf16, #tpu.memory_space<vmem>>, vector<2x8x8xbf16>,
    %81 = vector.extract_strided_slice %22 {offsets = [0, 0, 24], sizes = [2, 8, 8], strides = [1, 1, 1]} : vector<2x8x32xbf16> to vector<2x8x8xbf16>
    %82 = vector.extract_strided_slice %24 {offsets = [0, 0, 24], sizes = [2, 8, 8], strides = [1, 1, 1]} : vector<2x8x32xbf16> to vector<2x8x8xbf16>
    %83 = vector.extract_strided_slice %26 {offsets = [0, 0, 24], sizes = [2, 8, 8], strides = [1, 1, 1]} : vector<2x8x32xbf16> to vector<2x8x8xbf16>
    %cst_39 = arith.constant dense<0.000000e+00> : vector<2x8x8xf32>
    %84 = tpu.matmul %81, %82, %cst_39 {dimension_numbers = #tpu.dot_dimension_numbers<[2], [2], [1], [1], [0, 0, 0, 1, 1, 1], [0], [0]>} : vector<2x8x8xbf16>, vector<2x8x8xbf16>, vector<2x8x8xf32> -> vector<2x8x8xf32>
    %cst_40 = arith.constant dense<0xFF800000> : vector<2x8xf32>
    %85 = vector.multi_reduction <maximumf>, %84, %cst_40 [2] : vector<2x8x8xf32> to vector<2x8xf32>
    %86 = vector.shape_cast %85 : vector<2x8xf32> to vector<2x8x1xf32>
    %87 = vector.broadcast %86 : vector<2x8x1xf32> to vector<2x8x8xf32>
    %88 = arith.subf %84, %87 : vector<2x8x8xf32>
    %89 = math.exp %88 : vector<2x8x8xf32>
    %cst_41 = arith.constant dense<0.000000e+00> : vector<2x8xf32>
    %90 = vector.multi_reduction <add>, %89, %cst_41 [2] : vector<2x8x8xf32> to vector<2x8xf32>
    %91 = vector.shape_cast %90 : vector<2x8xf32> to vector<2x8x1xf32>
    %92 = arith.truncf %89 : vector<2x8x8xf32> to vector<2x8x8xbf16>
    %cst_42 = arith.constant dense<0.000000e+00> : vector<2x8x8xf32>
    %93 = tpu.matmul %92, %83, %cst_42 {dimension_numbers = #tpu.dot_dimension_numbers<[2], [1], [1], [2], [0, 0, 0, 1, 1, 2], [0], [0]>} : vector<2x8x8xbf16>, vector<2x8x8xbf16>, vector<2x8x8xf32> -> vector<2x8x8xf32>
    %94 = tpu.reciprocal %91 {approx = true} : vector<2x8x1xf32> -> vector<2x8x1xf32>
    %95 = vector.broadcast %94 : vector<2x8x1xf32> to vector<2x8x8xf32>
    %96 = arith.mulf %93, %95 : vector<2x8x8xf32>
    %97 = arith.truncf %96 : vector<2x8x8xf32> to vector<2x8x8xbf16>
    %c0_43 = arith.constant 0 : index
    %c0_44 = arith.constant 0 : index
    %c24 = arith.constant 24 : index
    %98 = vector.load %arg7[%c0_43, %c0_44, %c24] : memref<2x8x32xbf16, #tpu.memory_space<vmem>>, vector<2x8x8xbf16>
    tpu.vector_store %arg7[%c0_43, %c0_44, %c24], %97 {strides = array<i32>} : memref<2x8x32xbf16, #tpu.memory_space<vmem>>, vector<2x8x8xbf16>,
    %c0_45 = arith.constant 0 : index
    %c0_46 = arith.constant 0 : index
    %c0_47 = arith.constant 0 : index
    %99 = vector.load %arg7[%c0_45, %c0_46, %c0_47] : memref<2x8x32xbf16, #tpu.memory_space<vmem>>, vector<2x8x32xbf16>
    %100 = vector.shape_cast %99 : vector<2x8x32xbf16> to vector<16x32xbf16>
    %cst_48 = arith.constant dense<0.000000e+00> : vector<16x32xf32>
    %101 = tpu.matmul %100, %18, %cst_48 {dimension_numbers = #tpu.dot_dimension_numbers<[1], [0], [0], [1], [0, 0, 1, 1], [], []>} : vector<16x32xbf16>, vector<32x32xbf16>, vector<16x32xf32> -> vector<16x32xf32>
    %102 = vector.shape_cast %101 : vector<16x32xf32> to vector<2x8x32xf32>
    %c0_49 = arith.constant 0 : index
    %c0_50 = arith.constant 0 : index
    %c0_51 = arith.constant 0 : index
    %103 = vector.load %arg6[%c0_49, %c0_50, %c0_51] : memref<2x8x32xf32, #tpu.memory_space<vmem>>, vector<2x8x32xf32>
    tpu.vector_store %arg6[%c0_49, %c0_50, %c0_51], %102 {strides = array<i32>} : memref<2x8x32xf32, #tpu.memory_space<vmem>>, vector<2x8x32xf32>,
    return
  }
  func.func @transform_0(%arg0: i32) -> (i32, i32, i32) {
    %c0_i32 = arith.constant 0 : i32
    %c0_i32_0 = arith.constant 0 : i32
    %c0_i32_1 = arith.constant 0 : i32
    return %arg0, %c0_i32, %c0_i32_0 : i32, i32, i32
  }
  func.func @transform_1(%arg0: i32) -> (i32, i32, i32) {
    %c0_i32 = arith.constant 0 : i32
    %c0_i32_0 = arith.constant 0 : i32
    %c0_i32_1 = arith.constant 0 : i32
    return %arg0, %c0_i32, %c0_i32_0 : i32, i32, i32
  }
  func.func @transform_2(%arg0: i32) -> (i32, i32, i32) {
    %c0_i32 = arith.constant 0 : i32
    %c0_i32_0 = arith.constant 0 : i32
    %c0_i32_1 = arith.constant 0 : i32
    return %arg0, %c0_i32, %c0_i32_0 : i32, i32, i32
  }
  func.func @transform_3(%arg0: i32) -> (i32, i32, i32) {
    %c0_i32 = arith.constant 0 : i32
    %c0_i32_0 = arith.constant 0 : i32
    %c0_i32_1 = arith.constant 0 : i32
    %c0_i32_2 = arith.constant 0 : i32
    return %c0_i32, %c0_i32_0, %c0_i32_1 : i32, i32, i32
  }
  func.func @transform_4(%arg0: i32) -> (i32, i32) {
    %c0_i32 = arith.constant 0 : i32
    %c0_i32_0 = arith.constant 0 : i32
    %c0_i32_1 = arith.constant 0 : i32
    return %c0_i32, %c0_i32_0 : i32, i32
  }
  func.func @transform_5(%arg0: i32) -> (i32, i32, i32) {
    %c0_i32 = arith.constant 0 : i32
    %c0_i32_0 = arith.constant 0 : i32
    %c0_i32_1 = arith.constant 0 : i32
    return %arg0, %c0_i32, %c0_i32_0 : i32, i32, i32
  }
}

</mosaic_0001>

<bundles_post_ra>
// kernel: tpu_custom_call.1
= control target key start
LH: loop header
LB: loop body
LE: loop exit
PB: predicated region body
PF: predicated region fallthrough
CT: control target
= control target key end

     0   :  { %s2931_s0 = inlined_call_operand.hbm [shape: f32[4,8,32], index: 0, kind: input, shape index: {}]   ;;  %s2932_s1 = inlined_call_operand.hbm [shape: f32[4,8,32], index: 1, kind: input, shape index: {}]   ;;  %s2933_s2 = inlined_call_operand.hbm [shape: f32[4,8,32], index: 2, kind: input, shape index: {}]   ;;  %s2934_s3 = inlined_call_operand.hbm [shape: bf16[3,32,32], index: 3, kind: input, shape index: {}]   ;;  %s2935_s4 = inlined_call_operand.hbm [shape: bf16[32,32], index: 4, kind: input, shape index: {}]   ;;  %s2936_s5 = inlined_call_operand.hbm [shape: f32[4,8,32], index: 5, kind: output, shape index: {}]  }
   0x1   :  { %2954 = sst [smem:[#allocation20_spill]] %s2932_s1 }
   0x2   :  { %2955 = sst [smem:[#allocation21_spill]] %s2934_s3 }
   0x3   :  { %10 = vsyncpa [#allocation4], 0 }
   0x4   :  { %12 = vsyncpa [#allocation4 + $0x1], 0 }
   0x5   :  { %13 = vsyncpa [#allocation7], 0 }
   0x6   :  { %15 = vsyncpa [#allocation7 + $0x1], 0 }
   0x7   :  { %16 = vsyncpa [#allocation10], 0 }
   0x8   :  { %17 = vsyncpa [#allocation5], 0 }
   0x9   :  { %19 = vsyncpa [#allocation5 + $0x1], 0  ;;  %s2391_s18 = smov 0   ;;  %s2393_s19 = smov 0  }
   0xa   :  { %s2395_s20 = smov 0   ;;  %s2397_s21 = smov 0  }
   0xb LB: > { %2956 = sst [smem:[#allocation17_spill]] %s2340_s21  ;;  %s2412_s22 = sadd.s32 4294967295, %s2340_s21   ;;  %s2340_s21 = sphi %s2397_s21, %s2987_s21   ;;  %s2336_s20 = sphi %s2395_s20, %s2991_s20   ;;  %s2332_s19 = sphi %s2393_s19, %s2990_s19   ;;  %s2328_s18 = sphi %s2391_s18, %s2989_s18  }
   0xc   : > { %s1728_s23 = sadd.s32 4294967294, %s2340_s21   ;;  %s2416_s24 = sadd.s32 1, %s2340_s21  }
   0xd   : > { %2957 = sst [smem:[#allocation18_spill]] %s2416_s24  ;;  %s32_s25 = sadd.s32 1, %s2336_s20 }
   0xe   : > { %s29_s26 = ssub.s32 %s2340_s21, %s2416_s24  ;;  %p39_p0 = scmp.ne.s32.totalorder %s2336_s20, %s2332_s19 }
   0xf   : > { %p30_p1 = scmp.eq.s32.totalorder %s29_s26, 0  ;;  %p40_p2 = scmp.eq.s32.totalorder %s2340_s21, 0 }
  0x10   : > { %p45_p3 = scmp.ne.s32.totalorder %s2332_s19, %s2328_s18  ;;  %p2937_p4 = scmp.eq.s32.totalorder %s2412_s22, 0 }
  0x11   : > { %s2428_s27 = scalar_select %p30_p1, %s2336_s20, %s32_s25  }
  0x12   : > { %p2430_p5 = por %p40_p2, %p39_p0  ;;  %p2436_p6 = por %p2937_p4, %p45_p3 }
  0x13   : > { %2958 = sst [smem:[#allocation19_spill]] %s2428_s27  ;;  %p163_p7 = scmp.eq.s32.totalorder %s2412_s22, 1 }
  0x14   : > { %s2959_s28 = scalar_select %p2430_p5, 1, 0 }
  0x15   : > { %s2960_s29 = scalar_select %p2436_p6, 1, 0 }
  0x16   : > { %p169_p8 = scmp.eq.s32.totalorder %s1728_s23, 1  ;;  %p1729_p9 = scmp.ge.s32.totalorder %s2340_s21, 1 }
  0x17   : > { %p176_p10 = scmp.lt.s32.totalorder %s2340_s21, 3  ;;  %p2443_p11 = por %p163_p7, %p39_p0 }
  0x18   : > { %p2447_p12 = por %p169_p8, %p45_p3  ;;  %s2342_s8 = smov [#allocation9]  }
  0x19   : > { %s2961_s30 = scalar_select %p2443_p11, 1, 0 }
  0x1a   : > { %s2962_s6 = scalar_select %p2447_p12, 1, 0 }
  0x1b   : > { %p2451_p13 = pnand %p1729_p9, %p176_p10  ;;  %s188_s9 = sshll.u32 %s2342_s8, 4  ;;  %s189_s9 = int_to_ptr.vmem [resolvable:$true] %s188_s9 }
  0x1c   : > { %s2941_s11 = sand.u32 1, %s2336_s20   ;;  %s2965_s3 = sld [smem:[#allocation21_spill]] }
  0x1d   : > { %s2963_s7 = scalar_select %p2451_p13, 1, 0 }
  0x1e   : > { %p2005_p1 = pneg %p2451_p13  ;;  %s2468_s12 = sshll.u32 %s2941_s11, 4 }
  0x20   : > { %p2459_p2 = pnand %p2005_p1, %p2937_p4 }
  0x22   : > { %s2964_s10 = scalar_select %p2459_p2, 1, 0 }
  0x23   : > { %s2120_s15 = scalar_lea.hbm %s2965_s3, 768  ;;  %p2944_p8 = pneg %p2459_p2 }
  0x24   : > { %p2121_p7 = scmp.ne.s32.totalorder %s2965_s3, %s2120_s15  ;;  %p2127_p1 = scmp.lt.u32.totalorder %s2120_s15, %s2965_s3 }
  0x26   : > { %p2123_p9 = pnand %p2944_p8, %p2121_p7 }
  0x28   : > { %p2124_p10 = pneg %p2123_p9 }
  0x2a   : > { %p2129_p0 = pnand %p2127_p1, %p2124_p10 }
  0x2c   : > { %2132 = shalt.err (!%p2129_p0)
}
  0x2d   : > { %s2133_s26 = scalar_lea.vmem %s189_s9, 768  ;;  %p2141_p11 = scmp.lt.s32.totalorder %s189_s9, %s189_s9 }
  0x2e   : > { %p2134_p4 = scmp.ne.s32.totalorder %s189_s9, %s2133_s26  ;;  %p2142_p6 = scmp.lt.s32.totalorder %s2133_s26, %s2133_s26 }
  0x30   : > { %p2136_p3 = pnand %p2134_p4, %p2944_p8  ;;  %p2143_p13 = por %p2142_p6, %p2141_p11 }
  0x32   : > { %p2137_p12 = pneg %p2136_p3 }
  0x34   : > { %p2144_p5 = pnand %p2143_p13, %p2137_p12 }
  0x36   : > { %2147 = shalt.err (!%p2144_p5)
}
  0x37   : > { %s2942_s8 = smov 64   ;;  %s2943_s13 = smov 4  }
  0x38   : > { %2008 = dma.hbm_to_vmem [thread:$0]  (!%p2459_p2), %s2965_s3, 768, %s189_s9, [#allocation10], %s2942_s8, %s2942_s8, %s2943_s13  }
  0x39   : > { %s2496_s16 = sshll.u32 %s2340_s21, 8  ;;  %p2966_p4 = scmp.ne.s32.totalorder %s2959_s28, 0 }
  0x3a   : > { %p2967_p5 = scmp.lt.s32.totalorder %s2340_s21, 2  ;;  %s236_s23 = sand.u32 1, %s2340_s21  }
  0x3b   : > { %s2969_s1 = sld [smem:[#allocation20_spill]]  ;;  %s240_s9 = scalar_lea.vmem [#allocation6], %s2468_s12 }
  0x3c   : > { %p2502_p6 = pnand %p2967_p5, %p2966_p4  ;;  %s247_s14 = sshll.u32 %s240_s9, 4  ;;  %s2514_s14 = int_to_ptr.vmem [resolvable:$true] %s247_s14 }
  0x3d   : > { %s2516_s28 = scalar_lea.sflag [#allocation7], %s236_s23 }
  0x3e   : > { %s2968_s17 = scalar_select %p2502_p6, 1, 0 }
  0x3f   : > { %p2522_p12 = pneg %p2502_p6 }
  0x41   : > { %s2511_s11 = scalar_lea.hbm %s2969_s1, %s2496_s16  ;;  %s2153_s13 = scalar_lea.hbm %s2969_s1, 512 }
  0x42   : > { %s2148_s15 = scalar_lea.hbm %s2511_s11, 256  ;;  %p2154_p3 = scmp.lt.u32.totalorder %s2511_s11, %s2969_s1 }
  0x43   : > { %p2149_p11 = scmp.ne.s32.totalorder %s2511_s11, %s2148_s15  ;;  %p2155_p7 = scmp.lt.u32.totalorder %s2153_s13, %s2148_s15 }
  0x44   : > { %s2970_s8 = scalar_select %p2522_p12, 1, 0 }
  0x45   : > { %p2151_p13 = pnand %p2522_p12, %p2149_p11  ;;  %p2156_p9 = por %p2155_p7, %p2154_p3 }
  0x46   : > { %p2157_p10 = scmp.lt.u32.totalorder %s2148_s15, %s2511_s11 }
  0x47   : > { %p2152_p0 = pneg %p2151_p13 }
  0x48   : > { %p2158_p1 = por %p2157_p10, %p2156_p9 }
  0x4a   : > { %p2159_p4 = pnand %p2158_p1, %p2152_p0 }
  0x4c   : > { %2162 = shalt.err (!%p2159_p4)
}
  0x4d   : > { %s2163_s23 = scalar_lea.vmem %s2514_s14, 256  ;;  %s2345_s25 = smov [#allocation6]  }
  0x4e   : > { %p2164_p5 = scmp.ne.s32.totalorder %s2514_s14, %s2163_s23  ;;  %s2168_s26 = sshll.u32 %s2345_s25, 4  ;;  %s2169_s26 = int_to_ptr.vmem [resolvable:$false] %s2168_s26 }
  0x4f   : > { %s2170_s3 = scalar_lea.vmem %s2169_s26, 512  ;;  %p2171_p8 = scmp.lt.s32.totalorder %s2514_s14, %s2169_s26 }
  0x50   : > { %p2166_p11 = pnand %p2164_p5, %p2522_p12  ;;  %p2172_p2 = scmp.lt.s32.totalorder %s2170_s3, %s2163_s23 }
  0x52   : > { %p2167_p13 = pneg %p2166_p11  ;;  %p2173_p3 = por %p2172_p2, %p2171_p8 }
  0x54   : > { %p2174_p7 = pnand %p2173_p3, %p2167_p13 }
  0x56   : > { %2177 = shalt.err (!%p2174_p7)
}
  0x57   : > { %s2346_s13 = smov 128   ;;  %s2347_s15 = smov 8  }
  0x58   : > { %2018 = dma.hbm_to_vmem [thread:$0]  (!%p2502_p6), %s2511_s11, 256, %s2514_s14, %s2516_s28, %s2346_s13, %s2346_s13, %s2347_s15  }
  0x59   : > { %s2348_s9 = smov [#allocation11]   ;;  %s2178_s3 = scalar_lea.hbm %s2935_s4, 256 }
  0x5a   : > { %s201_s25 = sshll.u32 %s2348_s9, 4  ;;  %p2179_p2 = scmp.ne.s32.totalorder %s2935_s4, %s2178_s3  ;;  %s202_s25 = int_to_ptr.vmem [resolvable:$true] %s201_s25 }
  0x5b   : > { %p2971_p8 = scmp.ne.s32.totalorder %s2964_s10, 0  ;;  %p2185_p1 = scmp.lt.u32.totalorder %s2178_s3, %s2935_s4 }
  0x5d   : > { %p2972_p0 = pneg %p2971_p8 }
  0x5f   : > { %p2181_p9 = pnand %p2179_p2, %p2972_p0 }
  0x61   : > { %p2182_p10 = pneg %p2181_p9 }
  0x63   : > { %p2187_p4 = pnand %p2185_p1, %p2182_p10 }
  0x65   : > { %2190 = shalt.err (!%p2187_p4)
}
  0x66   : > { %s2191_s11 = scalar_lea.vmem %s202_s25, 256  ;;  %p2973_p11 = pmov %p2972_p0 }
  0x67   : > { %p2192_p5 = scmp.ne.s32.totalorder %s202_s25, %s2191_s11  ;;  %p2199_p7 = scmp.lt.s32.totalorder %s202_s25, %s202_s25 }
  0x68   : > { %p2200_p6 = scmp.lt.s32.totalorder %s2191_s11, %s2191_s11 }
  0x69   : > { %p2194_p13 = pnand %p2192_p5, %p2973_p11 }
  0x6a   : > { %p2201_p12 = por %p2200_p6, %p2199_p7 }
  0x6b   : > { %p2195_p3 = pneg %p2194_p13 }
  0x6d   : > { %p2202_p0 = pnand %p2201_p12, %p2195_p3 }
  0x6f   : > { %2205 = shalt.err (!%p2202_p0)
}
  0x70   : > { %s2974_s1 = smov 4   ;;  %s2975_s27 = smov 64  }
  0x71   : > { %2011 = dma.hbm_to_vmem [thread:$0]  (!%p2971_p8), %s2935_s4, 256, %s202_s25, [#allocation10], %s2975_s27, %s2975_s27, %s2974_s1  }
  0x72   : > { %s2576_s26 = scalar_lea.hbm %s2931_s0, %s2496_s16  ;;  %s219_s10 = scalar_lea.vmem [#allocation3], %s2468_s12 }
  0x73   : > { %s226_s23 = sshll.u32 %s219_s10, 4  ;;  %s2976_s3 = sand.u32 1, %s2336_s20   ;;  %s2579_s23 = int_to_ptr.vmem [resolvable:$true] %s226_s23 }
  0x74   : > { %s2583_s11 = scalar_lea.sflag [#allocation4], %s2976_s3  ;;  %s2206_s21 = scalar_lea.hbm %s2576_s26, 256 }
  0x75   : > { %p2207_p6 = scmp.ne.s32.totalorder %s2576_s26, %s2206_s21  ;;  %p2977_p12 = scmp.ne.s32.totalorder %s2970_s8, 0 }
  0x76   : > { %s2211_s27 = scalar_lea.hbm %s2931_s0, 512  ;;  %p2212_p9 = scmp.lt.u32.totalorder %s2576_s26, %s2931_s0 }
  0x77   : > { %p2209_p2 = pnand %p2207_p6, %p2977_p12  ;;  %p2213_p10 = scmp.lt.u32.totalorder %s2211_s27, %s2206_s21 }
  0x78   : > { %p2215_p4 = scmp.lt.u32.totalorder %s2206_s21, %s2576_s26 }
  0x79   : > { %p2210_p8 = pneg %p2209_p2  ;;  %p2214_p1 = por %p2213_p10, %p2212_p9 }
  0x7b   : > { %p2216_p5 = por %p2215_p4, %p2214_p1 }
  0x7d   : > { %p2217_p11 = pnand %p2216_p5, %p2210_p8 }
  0x7f   : > { %2220 = shalt.err (!%p2217_p11)
}
  0x80   : > { %s2221_s9 = scalar_lea.vmem %s2579_s23, 256  ;;  %s2349_s10 = smov [#allocation3]  }
  0x81   : > { %p2222_p13 = scmp.ne.s32.totalorder %s2579_s23, %s2221_s9  ;;  %s2226_s3 = sshll.u32 %s2349_s10, 4  ;;  %s2227_s3 = int_to_ptr.vmem [resolvable:$false] %s2226_s3 }
  0x82   : > { %s2228_s25 = scalar_lea.vmem %s2227_s3, 512  ;;  %p2229_p0 = scmp.lt.s32.totalorder %s2579_s23, %s2227_s3 }
  0x83   : > { %p2224_p3 = pnand %p2222_p13, %p2977_p12  ;;  %p2230_p6 = scmp.lt.s32.totalorder %s2228_s25, %s2221_s9 }
  0x85   : > { %p2225_p7 = pneg %p2224_p3  ;;  %p2231_p2 = por %p2230_p6, %p2229_p0 }
  0x87   : > { %p2232_p9 = pnand %p2231_p2, %p2225_p7 }
  0x89   : > { %2235 = shalt.err (!%p2232_p9)
}
  0x8a   : > { %p2978_p8 = scmp.ne.s32.totalorder %s2968_s17, 0  ;;  %s2614_s27 = scalar_lea.hbm %s2933_s2, %s2496_s16 }
  0x8b   : > { %s261_s24 = scalar_lea.vmem [#allocation8], %s2468_s12  ;;  %s2236_s9 = scalar_lea.hbm %s2614_s27, 256 }
  0x8c   : > { %2015 = dma.hbm_to_vmem [thread:$0]  (!%p2978_p8), %s2576_s26, 256, %s2579_s23, %s2583_s11, %s2346_s13, %s2346_s13, %s2347_s15  }
  0x8d   : > { %s268_s14 = sshll.u32 %s261_s24, 4  ;;  %p2237_p10 = scmp.ne.s32.totalorder %s2614_s27, %s2236_s9  ;;  %s2617_s14 = int_to_ptr.vmem [resolvable:$true] %s268_s14 }
  0x8e   : > { %s2241_s23 = scalar_lea.hbm %s2933_s2, 512  ;;  %p2242_p5 = scmp.lt.u32.totalorder %s2614_s27, %s2933_s2 }
  0x8f   : > { %p2239_p1 = pnand %p2237_p10, %p2977_p12  ;;  %p2243_p11 = scmp.lt.u32.totalorder %s2241_s23, %s2236_s9 }
  0x90   : > { %p2245_p3 = scmp.lt.u32.totalorder %s2236_s9, %s2614_s27 }
  0x91   : > { %p2240_p4 = pneg %p2239_p1  ;;  %p2244_p13 = por %p2243_p11, %p2242_p5 }
  0x93   : > { %p2246_p7 = por %p2245_p3, %p2244_p13 }
  0x95   : > { %p2247_p0 = pnand %p2246_p7, %p2240_p4 }
  0x97   : > { %2250 = shalt.err (!%p2247_p0)
}
  0x98   : > { %s2251_s12 = scalar_lea.vmem %s2617_s14, 256  ;;  %s2350_s3 = smov [#allocation8]  }
  0x99   : > { %p2252_p6 = scmp.ne.s32.totalorder %s2617_s14, %s2251_s12  ;;  %s2256_s25 = sshll.u32 %s2350_s3, 4  ;;  %s2257_s25 = int_to_ptr.vmem [resolvable:$false] %s2256_s25 }
  0x9a   : > { %s2258_s21 = scalar_lea.vmem %s2257_s25, 512  ;;  %p2259_p10 = scmp.lt.s32.totalorder %s2617_s14, %s2257_s25 }
  0x9b   : > { %p2254_p2 = pnand %p2252_p6, %p2977_p12  ;;  %p2260_p1 = scmp.lt.s32.totalorder %s2258_s21, %s2251_s12 }
  0x9d   : > { %p2255_p9 = pneg %p2254_p2  ;;  %p2261_p5 = por %p2260_p1, %p2259_p10 }
  0x9f   : > { %p2262_p11 = pnand %p2261_p5, %p2255_p9 }
  0xa1   : > { %2265 = shalt.err (!%p2262_p11)
}
  0xa2   : > { %2021 = dma.hbm_to_vmem [thread:$0]  (!%p2978_p8), %s2614_s27, 256, %s2617_s14, %s2516_s28, %s2346_s13, %s2346_s13, %s2347_s15  }
  0xa3   : > { %p2979_p12 = scmp.ne.s32.totalorder %s2963_s7, 0 }
  0xa4   : > { %s2647_s8 = sand.u32 (!%p2979_p12), 1, %s2332_s19   ;;  %p2980_p4 = scmp.ne.s32.totalorder (!%p2979_p12), %s2960_s29, 0 }
  0xa5   : > { %280 = sbr.rel (%p2979_p12) target bundleno = 2495 (0x9bf), region = 40  ;;  %s2650_s1 = sshll.u32 (!%p2979_p12), %s2647_s8, 4 }
  0xa6   : > { %s283_s17 = scalar_lea.sflag (!%p2979_p12), [#allocation4], %s2647_s8  ;;  %s286_s24 = scalar_lea.vmem (!%p2979_p12), [#allocation3], %s2650_s1 }
  0xac   : > { %2311 = dma.done.wait (%p2980_p4), %s283_s17, 256  }
  0xad   : > { %2313 = vsyncadd (%p2980_p4), %s283_s17, 4294967040  ;;  %s291_s7 = sand.u32 1, %s2412_s22   ;;  %s295_s13 = scalar_lea.vmem [#allocation6], %s2650_s1 }
  0xae   : > { %s292_s28 = scalar_lea.sflag [#allocation7], %s291_s7 }
  0xaf   : > { %2315 = dma.done.wait (%p2980_p4), %s292_s28, 512  }
  0xb0   : > { %2317 = vsyncadd (%p2980_p4), %s292_s28, 4294966784  ;;  %s304_s15 = scalar_lea.vmem [#allocation8], %s2650_s1  ;;  %p2981_p8 = scmp.eq.s32.totalorder %s2412_s22, 0 }
  0xb2   : > { %2319 = dma.done.wait (%p2981_p8), [#allocation10], 1024   ;;  %p2982_p13 = pmov %p2981_p8 }
  0xb3   : > { %v2351_v0 = vmov 0.0   ;;  %vm2352_vm0 = vmmov 0   ;;  %v2079_v1 = vld [vmem:[#allocation9 + $0x10] sm:$0xff]   ;;  %v2080_v2 = vld [vmem:[#allocation9] sm:$0xff]   ;;  %v2081_v3 = vld [vmem:[#allocation9 + $0x18] sm:$0xff]   ;;  %vm387_vm1 = vcmask 261120  }
  0xb4   : > { %2321 = vsyncadd (%p2982_p13), [#allocation10], 4294966272  ;;  %1869 = vmatprep.subr.bf16.mxu1 %v2351_v0  ;;  %1861 = vmatprep.subr.bf16.mxu0 %v2351_v0  ;;  %v358_v4 = vld [vmem:[%s295_s13] sm:$0xff]  ;;  %v359_v5 = vld [vmem:[%s295_s13 + $0x8] sm:$0xff]  ;;  %vm588_vm2 = vcmask 64512   ;;  %s2353_s29 = smov 120  }
  0xb5   : > { %1873 = vmatprep.mubr.msk.bf16.mxu1 %vm2352_vm0, %v2351_v0  ;;  %1865 = vmatprep.mubr.msk.bf16.mxu0 %vm2352_vm0, %v2351_v0  ;;  %v2082_v6 = vld [vmem:[#allocation9 + $0x8] sm:$0xff]   ;;  %v354_v7 = vld [vmem:[%s286_s24] sm:$0xff]  ;;  %v1802_v8 = vpack.c.bf16 %v359_v5, %v358_v4  ;;  %vm704_vm3 = vcmask 1043456   ;;  %s2354_s27 = smov 112   ;;  %s2355_s14 = smov 104   ;;  %vm800_vm4 = vcmask 60416  }
  0xb6   : > { %1870 = vmatpush3.bf16.msra.mxu1 %v2079_v1  ;;  %1862 = vmatpush3.bf16.msra.mxu0 %v2080_v2  ;;  %v355_v9 = vld [vmem:[%s286_s24 + $0x8] sm:$0xff]  ;;  %v2083_v11 = vld [vmem:[#allocation9 + $0x20] sm:$0xff]   ;;  %s2356_s9 = smov 8   ;;  %s2357_s10 = smov 16   ;;  %vm1037_vm5 = vcmask 126016   ;;  %vm1274_vm6 = vcmask 191616  }
  0xb7   : > { %1871 = vmatprep.subr.bf16.mxu1 %v2351_v0  ;;  %1863 = vmatprep.subr.bf16.mxu0 %v2351_v0  ;;  %v1801_v10 = vpack.c.bf16 %v355_v9, %v354_v7  ;;  %v2084_v12 = vld [vmem:[#allocation9 + $0x28] sm:$0xff]   ;;  %v362_v13 = vld [vmem:[%s304_s15] sm:$0xff]  ;;  %s2358_s26 = smov 24   ;;  %vm1511_vm7 = vcmask 257216   ;;  %s348_s23 = scalar_lea.vmem [#allocation12], %s2650_s1 }
  0xb8   : > { %v363_v14 = vld [vmem:[%s304_s15 + $0x8] sm:$0xff]  ;;  %s1593_s11 = sshll.u32 %s348_s23, 4  ;;  %s1816_s16 = sshll.u32 %s2412_s22, 8  ;;  %s2879_s11 = int_to_ptr.vmem [resolvable:$true] %s1593_s11 }
  0xb9   : > { %v1803_v15 = vpack.c.bf16 %v363_v14, %v362_v13  ;;  %s2885_s25 = scalar_lea.hbm %s2936_s5, %s1816_s16  ;;  %s1580_s21 = scalar_lea.sflag [#allocation5], %s2647_s8 }
  0xba   : > { %1872 = vmatpush3.bf16.msra.mxu1 %v2081_v3  ;;  %1864 = vmatpush3.bf16.msra.mxu0 %v2082_v6  ;;  %s2266_s22 = scalar_lea.vmem %s2879_s11, 256  ;;  %p2983_p7 = scmp.ne.s32.totalorder %s2961_s30, 0 }
  0xbb   : > { %1885 = vmatprep.subr.bf16.mxu1 %v2351_v0  ;;  %1877 = vmatprep.subr.bf16.mxu0 %v2351_v0  ;;  %p2267_p3 = scmp.ne.s32.totalorder %s2879_s11, %s2266_s22  ;;  %s2359_s1 = smov [#allocation12]  }
  0xbc   : > { %s2270_s17 = sshll.u32 %s2359_s1, 4  ;;  %s2271_s17 = int_to_ptr.vmem [resolvable:$false] %s2270_s17 }
  0xbd   : > { %1874 = vmatmul.mubr.msk.bf16.vlgmr.msra.gmra.mrb[0].mxu1 %vm387_vm1, %v1802_v8  ;;  %1866 = vmatmul.mubr.msk.bf16.vlgmr.msra.gmra.mrb[0].mxu0 %vm387_vm1, %v1801_v10  ;;  %p2268_p0 = pnand %p2267_p3, %p2983_p7  ;;  %s2272_s24 = scalar_lea.vmem %s2271_s17, 512 }
  0xbe   : > { %1887 = vmatprep.mubr.msk.bf16.mxu1 %vm2352_vm0, %v2351_v0  ;;  %1878 = vmatpush3.bf16.msra.mxu0 %v2083_v11  ;;  %p2273_p2 = scmp.lt.s32.totalorder %s2879_s11, %s2271_s17  ;;  %p2274_p9 = scmp.lt.s32.totalorder %s2272_s24, %s2266_s22 }
  0xbf   : > { %1881 = vmatprep.mubr.msk.bf16.mxu0 %vm2352_vm0, %v2351_v0  ;;  %1879 = vmatprep.subr.bf16.mxu0 %v2351_v0  ;;  %p2269_p6 = pneg %p2268_p0 }
  0xc0   : > { %p2275_p10 = por %p2274_p9, %p2273_p2 }
  0xc2   : > { %1880 = vmatpush3.bf16.msra.mxu0 %v2084_v12  ;;  %p2276_p1 = pnand %p2275_p10, %p2269_p6 }
  0xc3   : > { %1891 = vmatprep.subr.bf16.mxu0 %v2351_v0 }
  0xc5   : > { %1882 = vmatmul.mubr.msk.bf16.vlgmr.msra.gmra.mrb[4].mxu0 %vm387_vm1, %v1803_v15 }
  0xc6   : > { %1893 = vmatprep.mubr.msk.bf16.mxu0 %vm2352_vm0, %v2351_v0 }
 0x190   : > { %v491_v16 = vpop.f32.mrb[0].mxu1  ;;  %v425_v19 = vpop.f32.mrb[0].mxu0 }
 0x191   : > { %v2694_v17 = vpack.c.bf16 %v491_v16, %v491_v16  ;;  %v1875_v18 = vpop.f32.mrb[1].mxu1  ;;  %v1867_v21 = vpop.f32.mrb[1].mxu0  ;;  %v568_v24 = vmul.f32 0.35355338, %v425_v19 }
 0x192   : > { %v494_v20 = vpop.f32.mrb[2].mxu1  ;;  %v428_v26 = vpop.f32.mrb[2].mxu0 }
 0x193   : > { %v2696_v22 = vpack.c.bf16 %v494_v20, %v494_v20  ;;  %805 = vrot.lane.b32.xlu1 %v2694_v17, %s2353_s29  ;;  %v1876_v23 = vpop.f32.mrb[3].mxu1  ;;  %v593_v25 = vsel %vm588_vm2, %v2694_v17, 0  ;;  %v569_v27 = vmul.f32 0.35355338, %v428_v26  ;;  %v1868_v28 = vpop.f32.mrb[3].mxu0  ;;  %v2705_v30 = vpack.c.bf16 %v568_v24, %v568_v24 }
 0x194   : > { %1886 = vmatpush3.bf16.xpose.msra.mxu1 %v593_v25 }
 0x195   : > { %v639_v29 = vsel %vm588_vm2, %v2696_v22, 0  ;;  %1897 = vmatprep.subr.bf16.mxu1 %v2351_v0  ;;  %v2707_v31 = vpack.c.bf16 %v569_v27, %v569_v27 }
 0x196   : > { %1892 = vmatpush3.bf16.xpose.msra.mxu0 %v639_v29 }
 0x197   : > { %855 = vrot.lane.b32.xlu1 %v2696_v22, %s2353_s29  ;;  %1903 = vmatprep.subr.bf16.mxu0 %v2351_v0 }
 0x198   : > { %v557_v32 = vpop.f32.mrb[4].mxu0 }
 0x199   : > { %v2722_v33 = vpack.c.bf16 %v557_v32, %v557_v32  ;;  %v1883_v34 = vpop.f32.mrb[5].mxu0 }
 0x19a   : > { %v560_v35 = vpop.f32.mrb[6].mxu0 }
 0x19b   : > { %1888 = vmatmul.mubr.msk.bf16.vlgmr.msra.gmra.mrb[4].mxu1 %vm588_vm2, %v2705_v30  ;;  %853 = vrot.lane.b32.xlu1 %v2707_v31, %s2353_s29  ;;  %v2724_v36 = vpack.c.bf16 %v560_v35, %v560_v35  ;;  %v1884_v37 = vpop.f32.mrb[7].mxu0  ;;  %v706_v38 = vsel %vm704_vm3, %v2722_v33, 0 }
 0x19c   : > { %1899 = vmatprep.mubr.msk.bf16.mxu1 %vm2352_vm0, %v2351_v0  ;;  %1898 = vmatpush3.bf16.msra.mxu1 %v706_v38 }
 0x19d   : > { %1894 = vmatmul.mubr.msk.bf16.vlgmr.msra.gmra.mrb[8].mxu0 %vm588_vm2, %v2707_v31  ;;  %v752_v39 = vsel %vm704_vm3, %v2724_v36, 0  ;;  %1909 = vmatprep.subr.bf16.mxu1 %v2351_v0 }
 0x19e   : > { %1905 = vmatprep.mubr.msk.bf16.mxu0 %vm2352_vm0, %v2351_v0  ;;  %1904 = vmatpush3.bf16.msra.mxu0 %v752_v39 }
 0x19f   : > { %923 = vrot.lane.b32.xlu1 %v2722_v33, %s2353_s29  ;;  %1915 = vmatprep.subr.bf16.mxu0 %v2351_v0 }
 0x205   : > { %v806_v55 = vpop.permute.xlu1 %805 }
 0x206   : > { %v811_v60 = vsel %vm588_vm2, %v806_v55, 0 }
 0x209   : > { %v856_v57 = vpop.permute.xlu1 %855 }
 0x20a   : > { %v861_v1 = vsel %vm588_vm2, %v856_v57, 0 }
 0x20d   : > { %v854_v62 = vpop.permute.xlu1 %853 }
 0x211   : > { %v924_v2 = vpop.permute.xlu1 %923 }
 0x212   : > { %v929_v4 = vsel %vm704_vm3, %v924_v2, 0 }
 0x26e   : > { %v629_v40 = vpop.f32.mrb[4].mxu1 }
 0x26f   : > { %v1889_v41 = vpop.f32.mrb[5].mxu1  ;;  %v681_v42 = vsel %vm588_vm2, %v629_v40, -inf }
 0x270   : > { %682 = vmax.xlane.f32.xlu0 %v681_v42  ;;  %v632_v43 = vpop.f32.mrb[6].mxu1  ;;  %v675_v44 = vpop.f32.mrb[8].mxu0 }
 0x271   : > { %v1890_v45 = vpop.f32.mrb[7].mxu1  ;;  %v1895_v46 = vpop.f32.mrb[9].mxu0  ;;  %v684_v49 = vsel %vm588_vm2, %v675_v44, -inf }
 0x272   : > { %v678_v47 = vpop.f32.mrb[10].mxu0 }
 0x273   : > { %v1896_v48 = vpop.f32.mrb[11].mxu0 }
 0x274   : > { %685 = vmax.xlane.f32.xlu0 %v684_v49 }
 0x28a   : > { %803 = vrot.lane.b32.xlu0 %v2705_v30, %s2353_s29 }
 0x2fd   : > { %v683_v50 = vpop.xlane.xlu0 %682 }
 0x2fe   : > { %v687_v51 = vsub.f32 %v629_v40, %v683_v50 }
 0x300   : > { %v689_v52 = vmul.f32 1.442695, %v687_v51 }
 0x301   : > { %v686_v53 = vpop.xlane.xlu0 %685 }
 0x302   : > { %2088 = vpow2.f32 %v689_v52  ;;  %v688_v54 = vsub.f32 %v675_v44, %v686_v53 }
 0x304   : > { %v691_v56 = vmul.f32 1.442695, %v688_v54 }
 0x305   : > { %v804_v3 = vpop.permute.xlu0 %803 }
 0x306   : > { %2090 = vpow2.f32 %v691_v56 }
 0x30c   : > { %v2738_v58 = vpop.eup %2088 }
 0x30d   : > { %v699_v59 = vpack.c.bf16 %v2738_v58, %v2738_v58 }
 0x30f   : > { %1900 = vmatmul.mubr.msk.bf16.vlgmr.msra.gmra.mrb[8].mxu1 %vm588_vm2, %v699_v59 }
 0x310   : > { %v2744_v61 = vpop.eup %2090  ;;  %1910 = vmatpush3.bf16.xpose.msra.mxu1 %v811_v60  ;;  %1911 = vmatprep.mubr.msk.bf16.mxu1 %vm2352_vm0, %v2351_v0 }
 0x311   : > { %v700_v63 = vpack.c.bf16 %v2744_v61, %v2744_v61  ;;  %1921 = vmatprep.subr.bf16.mxu1 %v2351_v0 }
 0x313   : > { %1906 = vmatmul.mubr.msk.bf16.vlgmr.msra.gmra.mrb[12].mxu0 %vm588_vm2, %v700_v63 }
 0x314   : > { %1916 = vmatpush3.bf16.xpose.msra.mxu0 %v861_v1  ;;  %1917 = vmatprep.mubr.msk.bf16.mxu0 %vm2352_vm0, %v2351_v0 }
 0x315   : > { %1927 = vmatprep.subr.bf16.mxu0 %v2351_v0 }
 0x317   : > { %1912 = vmatmul.mubr.msk.bf16.vlgmr.msra.gmra.mrb[12].mxu1 %vm588_vm2, %v804_v3 }
 0x318   : > { %1922 = vmatpush3.bf16.msra.mxu1 %v929_v4  ;;  %1923 = vmatprep.mubr.msk.bf16.mxu1 %vm2352_vm0, %v2351_v0 }
 0x319   : > { %1933 = vmatprep.subr.bf16.mxu1 %v2351_v0 }
 0x31b   : > { %1918 = vmatmul.mubr.msk.bf16.vlgmr.msra.gmra.mrb[16].mxu0 %vm588_vm2, %v854_v62 }
 0x31c   : > { %1929 = vmatprep.mubr.msk.bf16.mxu0 %vm2352_vm0, %v2351_v0 }
 0x3e2   : > { %v2764_v5 = vpop.f32.mrb[8].mxu1 }
 0x3e3   : > { %v1901_v6 = vpop.f32.mrb[9].mxu1 }
 0x3e4   : > { %v745_v7 = vpop.f32.mrb[10].mxu1 }
 0x3e5   : > { %v1902_v8 = vpop.f32.mrb[11].mxu1 }
 0x3e6   : > { %v2766_v9 = vpop.f32.mrb[12].mxu0 }
 0x3e7   : > { %v1907_v10 = vpop.f32.mrb[13].mxu0 }
 0x3e8   : > { %v791_v11 = vpop.f32.mrb[14].mxu0 }
 0x3e9   : > { %v1908_v12 = vpop.f32.mrb[15].mxu0 }
 0x3ea   : > { %v847_v13 = vpop.f32.mrb[12].mxu1 }
 0x3eb   : > { %v1913_v14 = vpop.f32.mrb[13].mxu1  ;;  %v903_v15 = vsel %vm588_vm2, %v847_v13, -inf }
 0x3ec   : > { %904 = vmax.xlane.f32.xlu1 %v903_v15  ;;  %v850_v16 = vpop.f32.mrb[14].mxu1 }
 0x3ed   : > { %v1914_v18 = vpop.f32.mrb[15].mxu1 }
 0x3ee   : > { %v897_v19 = vpop.f32.mrb[16].mxu0 }
 0x3ef   : > { %v1919_v20 = vpop.f32.mrb[17].mxu0  ;;  %v906_v21 = vsel %vm588_vm2, %v897_v19, -inf }
 0x3f0   : > { %907 = vmax.xlane.f32.xlu0 %v906_v21  ;;  %v900_v23 = vpop.f32.mrb[18].mxu0 }
 0x3f1   : > { %v1920_v24 = vpop.f32.mrb[19].mxu0 }
 0x3fd   : > { %1042 = vrot.lane.b32.xlu1 %v2694_v17, %s2354_s27 }
 0x401   : > { %1092 = vrot.lane.b32.xlu1 %v2696_v22, %s2354_s27 }
 0x405   : > { %1040 = vrot.lane.b32.xlu1 %v2705_v30, %s2354_s27 }
 0x406   : > { %971 = vrot.lane.b32.xlu0 %v2724_v36, %s2353_s29 }
 0x409   : > { %1090 = vrot.lane.b32.xlu1 %v2707_v31, %s2354_s27 }
 0x40a   : > { %1160 = vrot.lane.b32.xlu0 %v2722_v33, %s2354_s27 }
 0x40d   : > { %1208 = vrot.lane.b32.xlu1 %v2724_v36, %s2354_s27 }
 0x479   : > { %v905_v25 = vpop.xlane.xlu1 %904 }
 0x47a   : > { %v909_v26 = vsub.f32 %v847_v13, %v905_v25 }
 0x47c   : > { %v911_v27 = vmul.f32 1.442695, %v909_v26 }
 0x47d   : > { %v1043_v28 = vpop.permute.xlu1 %1042  ;;  %v908_v29 = vpop.xlane.xlu0 %907 }
 0x47e   : > { %2092 = vpow2.f32 %v911_v27  ;;  %v910_v32 = vsub.f32 %v897_v19, %v908_v29  ;;  %v1048_v42 = vsel %vm588_vm2, %v1043_v28, 0 }
 0x480   : > { %v913_v34 = vmul.f32 1.442695, %v910_v32 }
 0x481   : > { %v972_v35 = vpop.permute.xlu0 %971  ;;  %v1093_v37 = vpop.permute.xlu1 %1092 }
 0x482   : > { %2094 = vpow2.f32 %v913_v34  ;;  %v977_v38 = vsel %vm704_vm3, %v972_v35, 0  ;;  %v1098_v46 = vsel %vm588_vm2, %v1093_v37, 0 }
 0x483   : > { %1928 = vmatpush3.bf16.msra.mxu0 %v977_v38 }
 0x484   : > { %1939 = vmatprep.subr.bf16.mxu0 %v2351_v0 }
 0x485   : > { %v1041_v40 = vpop.permute.xlu1 %1040  ;;  %v1161_v47 = vpop.permute.xlu0 %1160 }
 0x486   : > { %v1166_v48 = vsel %vm704_vm3, %v1161_v47, 0 }
 0x488   : > { %v2780_v39 = vpop.eup %2092 }
 0x489   : > { %v921_v41 = vpack.c.bf16 %v2780_v39, %v2780_v39  ;;  %v1091_v45 = vpop.permute.xlu1 %1090 }
 0x48b   : > { %1924 = vmatmul.mubr.msk.bf16.vlgmr.msra.gmra.mrb[16].mxu1 %vm588_vm2, %v921_v41 }
 0x48c   : > { %v2786_v43 = vpop.eup %2094  ;;  %1934 = vmatpush3.bf16.xpose.msra.mxu1 %v1048_v42  ;;  %1935 = vmatprep.mubr.msk.bf16.mxu1 %vm2352_vm0, %v2351_v0 }
 0x48d   : > { %v922_v44 = vpack.c.bf16 %v2786_v43, %v2786_v43  ;;  %1945 = vmatprep.subr.bf16.mxu1 %v2351_v0  ;;  %v1209_v49 = vpop.permute.xlu1 %1208 }
 0x48e   : > { %v1214_v50 = vsel %vm704_vm3, %v1209_v49, 0 }
 0x48f   : > { %1930 = vmatmul.mubr.msk.bf16.vlgmr.msra.gmra.mrb[20].mxu0 %vm588_vm2, %v922_v44 }
 0x490   : > { %1940 = vmatpush3.bf16.xpose.msra.mxu0 %v1098_v46  ;;  %1941 = vmatprep.mubr.msk.bf16.mxu0 %vm2352_vm0, %v2351_v0 }
 0x491   : > { %1951 = vmatprep.subr.bf16.mxu0 %v2351_v0 }
 0x493   : > { %1936 = vmatmul.mubr.msk.bf16.vlgmr.msra.gmra.mrb[20].mxu1 %vm588_vm2, %v1041_v40 }
 0x494   : > { %1946 = vmatpush3.bf16.msra.mxu1 %v1166_v48  ;;  %1947 = vmatprep.mubr.msk.bf16.mxu1 %vm2352_vm0, %v2351_v0  ;;  %v915_v48 = vsel %vm588_vm2, %v2780_v39, 0.0 }
 0x495   : > { %1957 = vmatprep.subr.bf16.mxu1 %v2351_v0 }
 0x497   : > { %1942 = vmatmul.mubr.msk.bf16.vlgmr.msra.gmra.mrb[24].mxu0 %vm588_vm2, %v1091_v45 }
 0x498   : > { %1952 = vmatpush3.bf16.msra.mxu0 %v1214_v50  ;;  %1953 = vmatprep.mubr.msk.bf16.mxu0 %vm2352_vm0, %v2351_v0  ;;  %v918_v50 = vsel %vm588_vm2, %v2786_v43, 0.0 }
 0x499   : > { %1963 = vmatprep.subr.bf16.mxu0 %v2351_v0 }
 0x55e   : > { %v2808_v51 = vpop.f32.mrb[16].mxu1 }
 0x55f   : > { %v1925_v52 = vpop.f32.mrb[17].mxu1 }
 0x560   : > { %v968_v53 = vpop.f32.mrb[18].mxu1 }
 0x561   : > { %v1926_v54 = vpop.f32.mrb[19].mxu1 }
 0x562   : > { %v2810_v55 = vpop.f32.mrb[20].mxu0 }
 0x563   : > { %v1931_v56 = vpop.f32.mrb[21].mxu0 }
 0x564   : > { %v1016_v57 = vpop.f32.mrb[22].mxu0 }
 0x565   : > { %v1932_v59 = vpop.f32.mrb[23].mxu0 }
 0x566   : > { %v1084_v60 = vpop.f32.mrb[20].mxu1 }
 0x567   : > { %v1937_v62 = vpop.f32.mrb[21].mxu1  ;;  %v1140_v63 = vsel %vm588_vm2, %v1084_v60, -inf }
 0x568   : > { %1141 = vmax.xlane.f32.xlu1 %v1140_v63  ;;  %v1087_v1 = vpop.f32.mrb[22].mxu1 }
 0x569   : > { %v1938_v2 = vpop.f32.mrb[23].mxu1 }
 0x56a   : > { %v1134_v3 = vpop.f32.mrb[24].mxu0 }
 0x56b   : > { %v1943_v4 = vpop.f32.mrb[25].mxu0  ;;  %v1143_v6 = vsel %vm588_vm2, %v1134_v3, -inf }
 0x56c   : > { %1144 = vmax.xlane.f32.xlu0 %v1143_v6  ;;  %v1137_v7 = vpop.f32.mrb[26].mxu0 }
 0x56d   : > { %v1944_v8 = vpop.f32.mrb[27].mxu0  ;;  %v696_v7 = vsel %vm588_vm2, %v2744_v61, 0.0 }
 0x579   : > { %1279 = vrot.lane.b32.xlu1 %v2694_v17, %s2355_s14 }
 0x57d   : > { %1277 = vrot.lane.b32.xlu1 %v2705_v30, %s2355_s14 }
 0x582   : > { %1329 = vrot.lane.b32.xlu0 %v2696_v22, %s2355_s14 }
 0x586   : > { %1327 = vrot.lane.b32.xlu0 %v2707_v31, %s2355_s14 }
 0x5f5   : > { %v1142_v10 = vpop.xlane.xlu1 %1141 }
 0x5f6   : > { %v1146_v11 = vsub.f32 %v1084_v60, %v1142_v10 }
 0x5f8   : > { %v1148_v12 = vmul.f32 1.442695, %v1146_v11 }
 0x5f9   : > { %v1145_v13 = vpop.xlane.xlu0 %1144  ;;  %v1280_v18 = vpop.permute.xlu1 %1279 }
 0x5fa   : > { %2096 = vpow2.f32 %v1148_v12  ;;  %v1147_v14 = vsub.f32 %v1134_v3, %v1145_v13  ;;  %v1285_v19 = vsel %vm588_vm2, %v1280_v18, 0  ;;  %v693_v3 = vsel %vm588_vm2, %v2738_v58, 0.0 }
 0x5fc   : > { %v1150_v15 = vmul.f32 1.442695, %v1147_v14 }
 0x5fd   : > { %v1330_v22 = vpop.permute.xlu0 %1329  ;;  %v1278_v21 = vpop.permute.xlu1 %1277 }
 0x5fe   : > { %2098 = vpow2.f32 %v1150_v15  ;;  %v1335_v20 = vsel %vm588_vm2, %v1330_v22, 0 }
 0x601   : > { %v1328_v23 = vpop.permute.xlu0 %1327 }
 0x604   : > { %v2097_v16 = vpop.eup %2096 }
 0x605   : > { %v1158_v17 = vpack.c.bf16 %v2097_v16, %v2097_v16  ;;  %v1152_v52 = vsel %vm588_vm2, %v2097_v16, 0.0 }
 0x607   : > { %1948 = vmatmul.mubr.msk.bf16.vlgmr.msra.gmra.mrb[24].mxu1 %vm588_vm2, %v1158_v17 }
 0x608   : > { %v2099_v30 = vpop.eup %2098  ;;  %1958 = vmatpush3.bf16.xpose.msra.mxu1 %v1285_v19  ;;  %1959 = vmatprep.mubr.msk.bf16.mxu1 %vm2352_vm0, %v2351_v0 }
 0x609   : > { %v1159_v31 = vpack.c.bf16 %v2099_v30, %v2099_v30  ;;  %1969 = vmatprep.subr.bf16.mxu1 %v2351_v0  ;;  %v1155_v49 = vsel %vm588_vm2, %v2099_v30, 0.0 }
 0x60b   : > { %1954 = vmatmul.mubr.msk.bf16.vlgmr.msra.gmra.mrb[28].mxu0 %vm588_vm2, %v1159_v31 }
 0x60c   : > { %1964 = vmatpush3.bf16.xpose.msra.mxu0 %v1335_v20  ;;  %1965 = vmatprep.mubr.msk.bf16.mxu0 %vm2352_vm0, %v2351_v0 }
 0x60d   : > { %1975 = vmatprep.subr.bf16.mxu0 %v2351_v0 }
 0x60f   : > { %1960 = vmatmul.mubr.msk.bf16.vlgmr.msra.gmra.mrb[28].mxu1 %vm588_vm2, %v1278_v21 }
 0x610   : > { %1971 = vmatprep.mubr.msk.bf16.mxu1 %vm2352_vm0, %v2351_v0 }
 0x613   : > { %1966 = vmatmul.mubr.msk.bf16.vlgmr.msra.gmra.mrb[32].mxu0 %vm588_vm2, %v1328_v23 }
 0x614   : > { %1977 = vmatprep.mubr.msk.bf16.mxu0 %vm2352_vm0, %v2351_v0 }
 0x6da   : > { %v2838_v24 = vpop.f32.mrb[24].mxu1 }
 0x6db   : > { %v1949_v25 = vpop.f32.mrb[25].mxu1 }
 0x6dc   : > { %v1205_v26 = vpop.f32.mrb[26].mxu1 }
 0x6dd   : > { %v1950_v27 = vpop.f32.mrb[27].mxu1 }
 0x6de   : > { %v2840_v28 = vpop.f32.mrb[28].mxu0 }
 0x6df   : > { %v1955_v29 = vpop.f32.mrb[29].mxu0 }
 0x6e0   : > { %v1253_v32 = vpop.f32.mrb[30].mxu0 }
 0x6e1   : > { %v1956_v34 = vpop.f32.mrb[31].mxu0 }
 0x6e2   : > { %v1321_v35 = vpop.f32.mrb[28].mxu1 }
 0x6e3   : > { %v1961_v37 = vpop.f32.mrb[29].mxu1  ;;  %v1377_v38 = vsel %vm588_vm2, %v1321_v35, -inf }
 0x6e4   : > { %1378 = vmax.xlane.f32.xlu1 %v1377_v38  ;;  %v1324_v40 = vpop.f32.mrb[30].mxu1  ;;  %v2086_v37 = vld [vmem:[#allocation11 + $0x8] sm:$0xff]  }
 0x6e5   : > { %v1962_v41 = vpop.f32.mrb[31].mxu1 }
 0x6e6   : > { %v1371_v42 = vpop.f32.mrb[32].mxu0 }
 0x6e7   : > { %v1967_v44 = vpop.f32.mrb[33].mxu0  ;;  %v1380_v45 = vsel %vm588_vm2, %v1371_v42, -inf }
 0x6e8   : > { %1381 = vmax.xlane.f32.xlu0 %v1380_v45  ;;  %v1374_v46 = vpop.f32.mrb[34].mxu0 }
 0x6e9   : > { %v1968_v47 = vpop.f32.mrb[35].mxu0 }
 0x6f5   : > { %1445 = vrot.lane.b32.xlu1 %v2724_v36, %s2355_s14 }
 0x6fe   : > { %1397 = vrot.lane.b32.xlu0 %v2722_v33, %s2355_s14 }
 0x719   : > { %916 = vadd.xlane.f32.xlu1 %v915_v48 }
 0x71d   : > { %1156 = vadd.xlane.f32.xlu1 %v1155_v49  ;;  %919 = vadd.xlane.f32.xlu0 %v918_v50 }
 0x721   : > { %1153 = vadd.xlane.f32.xlu0 %v1152_v52 }
 0x771   : > { %v1379_v53 = vpop.xlane.xlu1 %1378 }
 0x772   : > { %v1383_v54 = vsub.f32 %v1321_v35, %v1379_v53 }
 0x774   : > { %v1385_v36 = vmul.f32 1.442695, %v1383_v54 }
 0x775   : > { %v1446_v56 = vpop.permute.xlu1 %1445  ;;  %v1382_v57 = vpop.xlane.xlu0 %1381 }
 0x776   : > { %2100 = vpow2.f32 %v1385_v36  ;;  %v1451_v33 = vsel %vm704_vm3, %v1446_v56, 0  ;;  %v1384_v39 = vsub.f32 %v1371_v42, %v1382_v57 }
 0x777   : > { %1976 = vmatpush3.bf16.msra.mxu0 %v1451_v33 }
 0x778   : > { %v1387_v59 = vmul.f32 1.442695, %v1384_v39 }
 0x779   : > { %v1398_v60 = vpop.permute.xlu0 %1397 }
 0x77a   : > { %2102 = vpow2.f32 %v1387_v59  ;;  %v1403_v43 = vsel %vm704_vm3, %v1398_v60, 0 }
 0x77b   : > { %1970 = vmatpush3.bf16.msra.mxu1 %v1403_v43 }
 0x77c   : > { %1981 = vmatprep.subr.bf16.mxu1 %v2351_v0 }
 0x780   : > { %v2101_v62 = vpop.eup %2100 }
 0x781   : > { %v1389_v63 = vsel %vm588_vm2, %v2101_v62, 0.0  ;;  %v1395_v1 = vpack.c.bf16 %v2101_v62, %v2101_v62 }
 0x782   : > { %1390 = vadd.xlane.f32.xlu0 %v1389_v63 }
 0x783   : > { %1972 = vmatmul.mubr.msk.bf16.vlgmr.msra.gmra.mrb[32].mxu1 %vm588_vm2, %v1395_v1 }
 0x784   : > { %v2103_v2 = vpop.eup %2102  ;;  %1985 = vmatprep.mubr.msk.bf16.mxu1 %vm2352_vm0, %v2351_v0 }
 0x785   : > { %v1392_v4 = vsel %vm588_vm2, %v2103_v2, 0.0  ;;  %v1396_v6 = vpack.c.bf16 %v2103_v2, %v2103_v2 }
 0x786   : > { %694 = vadd.xlane.f32.xlu0 %v693_v3  ;;  %1393 = vadd.xlane.f32.xlu1 %v1392_v4 }
 0x787   : > { %1978 = vmatmul.mubr.msk.bf16.vlgmr.msra.gmra.mrb[36].mxu0 %vm588_vm2, %v1396_v6 }
 0x78a   : > { %697 = vadd.xlane.f32.xlu1 %v696_v7 }
 0x7a6   : > { %v917_v8 = vpop.xlane.xlu1 %916 }
 0x7a7   : > { %2104 = vrcp.f32 %v917_v8 }
 0x7aa   : > { %v1157_v10 = vpop.xlane.xlu1 %1156  ;;  %v920_v11 = vpop.xlane.xlu0 %919 }
 0x7ab   : > { %2106 = vrcp.f32 %v1157_v10 }
 0x7ac   : > { %2108 = vrcp.f32 %v920_v11 }
 0x7ae   : > { %v1154_v12 = vpop.xlane.xlu0 %1153 }
 0x7af   : > { %2110 = vrcp.f32 %v1154_v12 }
 0x7b1   : > { %v2105_v58 = vpop.eup %2104 }
 0x7b2   : > { %v1021_v13 = vmul.f32 %v2105_v58, %v2808_v51 }
 0x7b4   : > { %v1810_v14 = vpack.c.bf16 %v1021_v13, %v1021_v13 }
 0x7b5   : > { %v2107_v15 = vpop.eup %2106 }
 0x7b6   : > { %v2109_v16 = vpop.eup %2108  ;;  %1031 = vrot.lane.b32.xlu0 %v1810_v14, %s2356_s9  ;;  %v1259_v61 = vmul.f32 %v2107_v15, %v2840_v28 }
 0x7b7   : > { %v1022_v18 = vmul.f32 %v2109_v16, %v2810_v55 }
 0x7b8   : > { %v1813_v17 = vpack.c.bf16 %v1259_v61, %v1259_v61 }
 0x7b9   : > { %v2111_v19 = vpop.eup %2110  ;;  %v1811_v30 = vpack.c.bf16 %v1022_v18, %v1022_v18 }
 0x7ba   : > { %1270 = vrot.lane.b32.xlu0 %v1813_v17, %s2357_s10  ;;  %v1258_v22 = vmul.f32 %v2111_v19, %v2838_v24 }
 0x7bb   : > { %1033 = vrot.lane.b32.xlu1 %v1811_v30, %s2356_s9 }
 0x7bc   : > { %v1812_v51 = vpack.c.bf16 %v1258_v22, %v1258_v22 }
 0x7bf   : > { %1268 = vrot.lane.b32.xlu1 %v1812_v51, %s2357_s10 }
 0x80f   : > { %v1391_v31 = vpop.xlane.xlu0 %1390 }
 0x813   : > { %v1394_v20 = vpop.xlane.xlu1 %1393  ;;  %v695_v21 = vpop.xlane.xlu0 %694 }
 0x814   : > { %2112 = vrcp.f32 %v695_v21 }
 0x817   : > { %v698_v23 = vpop.xlane.xlu1 %697 }
 0x818   : > { %2114 = vrcp.f32 %v698_v23 }
 0x819   : > { %2116 = vrcp.f32 %v1391_v31 }
 0x81a   : > { %2118 = vrcp.f32 %v1394_v20 }
 0x81e   : > { %v2113_v25 = vpop.eup %2112 }
 0x81f   : > { %v796_v55 = vmul.f32 %v2113_v25, %v2764_v5  ;;  %v2085_v5 = vld [vmem:[#allocation11] sm:$0xff]  }
 0x820   : > { %1982 = vmatpush3.bf16.msra.mxu1 %v2085_v5 }
 0x821   : > { %v798_v27 = vpack.c.bf16 %v796_v55, %v796_v55  ;;  %1983 = vmatprep.subr.bf16.mxu1 %v2351_v0 }
 0x822   : > { %v2115_v26 = vpop.eup %2114 }
 0x823   : > { %v797_v28 = vmul.f32 %v2115_v26, %v2766_v9  ;;  %801 = vst.msk [vmem:[#allocation2] sm:$0xf] %vm800_vm4, %v798_v27  ;;  %v2117_v9 = vpop.eup %2116 }
 0x824   : > { %1984 = vmatpush3.bf16.msra.mxu1 %v2086_v37  ;;  %v2119_v46 = vpop.eup %2118 }
 0x825   : > { %v799_v24 = vpack.c.bf16 %v797_v28, %v797_v28 }
 0x827   : > { %802 = vst.msk [vmem:[#allocation2 + $0x4] sm:$0xf] %vm800_vm4, %v799_v24 }
 0x828   : > { %v1032_v29 = vpop.permute.xlu0 %1031 }
 0x829   : > { %1038 = vst.msk [vmem:[#allocation2] sm:$0xf] %vm1037_vm5, %v1032_v29 }
 0x82c   : > { %v1271_v32 = vpop.permute.xlu0 %1270 }
 0x82d   : > { %v1034_v34 = vpop.permute.xlu1 %1033 }
 0x82e   : > { %1039 = vst.msk [vmem:[#allocation2 + $0x4] sm:$0xf] %vm1037_vm5, %v1034_v34 }
 0x82f   : > { %1276 = vst.msk [vmem:[#allocation2 + $0x4] sm:$0xf] %vm1274_vm6, %v1271_v32 }
 0x831   : > { %v1269_v35 = vpop.permute.xlu1 %1268 }
 0x832   : > { %1275 = vst.msk [vmem:[#allocation2] sm:$0xf] %vm1274_vm6, %v1269_v35 }
 0x856   : > { %v1439_v38 = vpop.f32.mrb[32].mxu1 }
 0x857   : > { %v1495_v40 = vmul.f32 %v2117_v9, %v1439_v38  ;;  %v1973_v41 = vpop.f32.mrb[33].mxu1 }
 0x858   : > { %v1442_v42 = vpop.f32.mrb[34].mxu1 }
 0x859   : > { %v1814_v44 = vpack.c.bf16 %v1495_v40, %v1495_v40  ;;  %v1974_v45 = vpop.f32.mrb[35].mxu1 }
 0x85a   : > { %v1487_v47 = vpop.f32.mrb[36].mxu0 }
 0x85b   : > { %v1496_v48 = vmul.f32 %v2119_v46, %v1487_v47  ;;  %1505 = vrot.lane.b32.xlu1 %v1814_v44, %s2358_s26  ;;  %v1979_v49 = vpop.f32.mrb[37].mxu0 }
 0x85c   : > { %v1490_v50 = vpop.f32.mrb[38].mxu0 }
 0x85d   : > { %v1815_v52 = vpack.c.bf16 %v1496_v48, %v1496_v48  ;;  %v1980_v53 = vpop.f32.mrb[39].mxu0 }
 0x85f   : > { %1507 = vrot.lane.b32.xlu0 %v1815_v52, %s2358_s26 }
 0x8cd   : > { %v1506_v0 = vpop.permute.xlu1 %1505 }
 0x8ce   : > { %1512 = vst.msk [vmem:[#allocation2] sm:$0xf] %vm1511_vm7, %v1506_v0 }
 0x8d1   : > { %v1508_v54 = vpop.permute.xlu0 %1507 }
 0x8d2   : > { %1513 = vst.msk [vmem:[#allocation2 + $0x4] sm:$0xf] %vm1511_vm7, %v1508_v54 }
 0x8d9   : > { %v2087_v36 = vld [vmem:[#allocation2] sm:$0xff]  }
 0x8da   : > { %1986 = vmatmul.mubr.msk.bf16.vlgmr.msra.gmra.mrb[36].mxu1 %vm387_vm1, %v2087_v36 }
 0x9ad   : > { %v1570_v56 = vpop.f32.mrb[36].mxu1 }
 0x9ae   : > { %1577 = vst.msk [vmem:[%s348_s23] sm:$0xff] %vm387_vm1, %v1570_v56  ;;  %v1987_v57 = vpop.f32.mrb[37].mxu1 }
 0x9af   : > { %v1573_v33 = vpop.f32.mrb[38].mxu1 }
 0x9b0   : > { %1578 = vst.msk [vmem:[%s348_s23 + $0x8] sm:$0xff] %vm387_vm1, %v1573_v33  ;;  %v1988_v39 = vpop.f32.mrb[39].mxu1 }
 0x9b1   : > { %2279 = shalt.err (!%p2276_p1)
}
 0x9b2   : > { %s2280_s7 = scalar_lea.hbm %s2885_s25, 256  ;;  %s2284_s15 = scalar_lea.hbm %s2936_s5, 512 }
 0x9b3   : > { %p2281_p5 = scmp.ne.s32.totalorder %s2885_s25, %s2280_s7  ;;  %p2285_p4 = scmp.lt.u32.totalorder %s2885_s25, %s2936_s5 }
 0x9b4   : > { %p2286_p8 = scmp.lt.u32.totalorder %s2284_s15, %s2280_s7  ;;  %p2288_p3 = scmp.lt.u32.totalorder %s2280_s7, %s2885_s25 }
 0x9b5   : > { %p2282_p11 = pnand %p2281_p5, %p2983_p7 }
 0x9b6   : > { %p2287_p13 = por %p2286_p8, %p2285_p4 }
 0x9b7   : > { %p2283_p12 = pneg %p2282_p11 }
 0x9b8   : > { %p2289_p0 = por %p2288_p3, %p2287_p13 }
 0x9ba   : > { %p2290_p6 = pnand %p2289_p0, %p2283_p12 }
 0x9bc   : > { %2293 = shalt.err (!%p2290_p6)
}
 0x9bd   : > { %s2360_s14 = smov 128  }
 0x9be   : > { %2003 = dma.vmem_to_hbm [thread:$0]  (%p2983_p7), %s2879_s11, 256, %s2885_s25, %s1580_s21, %s2360_s14, %s2360_s14, %s2356_s9  }
 0x9bf PF: > { %s2984_s10 = sld [smem:[#allocation17_spill]]  ;;  %s1608_s26 = sand.u32 1, %s2328_s18  }
 0x9c0   : > { %p2985_p2 = scmp.ne.s32.totalorder %s2962_s6, 0  ;;  %s1609_s23 = scalar_lea.sflag [#allocation5], %s1608_s26 }
 0x9c5   : > { %p2986_p9 = scmp.ge.s32.totalorder %s2984_s10, 2 }
 0x9c7   : > { %p2023_p10 = pnand %p2986_p9, %p2985_p2 }
 0x9c9   : > { %2323 = dma.done.wait (!%p2023_p10), %s1609_s23, 256  }
 0x9ca   : > { %2325 = vsyncadd (!%p2023_p10), %s1609_s23, 4294967040  ;;  %s2987_s21 = sld [smem:[#allocation18_spill]]  ;;  %s2988_s30 = sld [smem:[#allocation19_spill]] }
 0x9cb   : > { %s2989_s18 = smov %s2332_s19  ;;  %s2990_s19 = smov %s2336_s20 }
 0x9d0   : > { %p22_p1 = scmp.ge.s32.totalorder %s2987_s21, 4   ;;  %s2991_s20 = smov %s2988_s30 }
 0x9d2   :  { %24 = sbr.rel (!%p22_p1) target bundleno = 11 (0xb), region = 119 }
 0x9d9   :  { %1614 = vsyncpa [#allocation4], 1 }
 0x9da   :  { %1616 = vsyncpa [#allocation4 + $0x1], 1 }
 0x9db   :  { %1617 = vsyncpa [#allocation7], 1 }
 0x9dc   :  { %1619 = vsyncpa [#allocation7 + $0x1], 1 }
 0x9dd   :  { %1620 = vsyncpa [#allocation10], 1 }
 0x9de   :  { %1621 = vsyncpa [#allocation5], 1 }
 0x9df   :  { %1623 = vsyncpa [#allocation5 + $0x1], 1 }

</bundles_post_ra>
